<compile_context>
chip_gen: v6e
topology: v6e:2x2x1
jax: 0.10.0
libtpu: 0.0.40
codegen_flags: <defaults>
</compile_context>

<pallas_src>
import functools

import jax
import jax.numpy as jnp
from jax.experimental import pallas as pl
from jax.experimental.pallas import tpu as pltpu


def _layernorm(z, g, b, eps=1e-6):
    # Matches nn.LayerNorm(eps=1e-6) used by MARDecoder (f32 math).
    mu = jnp.mean(z, axis=-1, keepdims=True)
    var = jnp.mean((z - mu) ** 2, axis=-1, keepdims=True)
    return (z - mu) * jax.lax.rsqrt(var + eps) * g + b


def _vmem_limit_bytes():
    # v5e/v6e: 128 MiB physical VMEM; v7x: 64 MiB.  Budget 75% for this kernel.
    try:
        cap = pltpu.get_tpu_info().vmem_capacity_bytes
    except Exception:
        cap = 64 * 1024 * 1024
    return int(cap * 0.75)


# ----------------------------------------------------------------------------
# Fused decoder kernel.
# Grid: (batch_tiles [parallel], depth [arbitrary], mlp_hidden_chunks [arbitrary])
# One (l, k) step = attention (only at k==0) + one MLP hidden chunk.
# Final decoder LayerNorm fused on the last (l, k) step.
# ----------------------------------------------------------------------------
def _decoder_kernel(x_ref,
                    ln1w, ln1b, wqkv, bqkv, wproj, bproj,
                    ln2w, ln2b, w1, b1, w2, b2,
                    normw, normb,
                    o_ref,
                    ctx_ref, xn2_ref,
                    *, num_heads, head_dim, batch_tile, seq):
    l = pl.program_id(1)
    k = pl.program_id(2)
    n_layers = pl.num_programs(1)
    n_chunks = pl.num_programs(2)

    D = num_heads * head_dim
    Mc = batch_tile * seq

    # Seed the resident activation (carried in the output block) once per
    # batch tile.  x arrives bf16 (halves the input DMA); carry stays f32.
    @pl.when((l == 0) & (k == 0))
    def _seed():
        o_ref[...] = x_ref[...].astype(jnp.float32)

    # -------- attention + LN2 (once per layer, on the first MLP chunk) --------
    @pl.when(k == 0)
    def _attention():
        x = o_ref[...].reshape(Mc, D)
        xn1 = _layernorm(x, ln1w[...], ln1b[...])
        qkv = jnp.dot(xn1.astype(jnp.bfloat16), wqkv[...],
                      preferred_element_type=jnp.float32) + bqkv[...]   # (Mc, 3D)

        scale = head_dim ** -0.5
        # Leading-dim reshapes (Mc,D)->(bt,T,D) are layout-free (T % 8 == 0).
        q = (qkv[:, 0 * D:1 * D] * scale).astype(jnp.bfloat16).reshape(
            batch_tile, seq, D)
        kk = qkv[:, 1 * D:2 * D].astype(jnp.bfloat16).reshape(batch_tile, seq, D)
        v = qkv[:, 2 * D:3 * D].astype(jnp.bfloat16).reshape(batch_tile, seq, D)

        # TODO(synk): for large num_heads a lax.fori_loop(unroll=True) over heads
        # would bound per-head live ranges better than Python unrolling.
        for h in range(num_heads):
            lo = h * head_dim
            qh = q[:, :, lo:lo + head_dim]          # (bt, T, hd) bf16
            kh = kk[:, :, lo:lo + head_dim]
            vh = v[:, :, lo:lo + head_dim]
            # Batched over the batch tile: bt*T^2 scores, no mask, no transpose.
            s = jnp.einsum('bqd,bkd->bqk', qh, kh,
                           preferred_element_type=jnp.float32)          # f32
            s = s - jnp.max(s, axis=-1, keepdims=True)
            p = jnp.exp(s)
            p = p * pl.reciprocal(jnp.sum(p, axis=-1, keepdims=True), approx=True)
            ctx = jnp.einsum('bqk,bkd->bqd', p.astype(jnp.bfloat16), vh,
                             preferred_element_type=jnp.float32)        # (bt,T,hd)
            ctx_ref[:, lo:lo + head_dim] = (
                ctx.reshape(Mc, head_dim).astype(jnp.bfloat16))

        # Single full-K output projection (fills the MXU contraction depth).
        attn_out = jnp.dot(ctx_ref[...], wproj[...],
                           preferred_element_type=jnp.float32)          # (Mc, D)
        # b2 (the second MLP bias) is layer-constant; fold it into the residual
        # here so the per-chunk MLP update below is bias-free.
        x = x + attn_out + bproj[...] + b2[...]
        xn2_ref[...] = _layernorm(x, ln2w[...], ln2b[...]).astype(jnp.bfloat16)
        o_ref[...] = x.reshape(batch_tile, seq, D)

    # -------- MLP: one hidden-dimension chunk (streams w1/w2 tiles) --------
    h1 = jnp.dot(xn2_ref[...], w1[...],
                 preferred_element_type=jnp.float32) + b1[...]          # (Mc, hm)
    # TODO(synk): timm's nn.GELU is exact (erf); tanh approximation used since
    # erf lowering availability varies across Mosaic versions.
    h1 = jax.nn.gelu(h1, approximate=True)
    y = jnp.dot(h1.astype(jnp.bfloat16), w2[...],
                preferred_element_type=jnp.float32)                     # (Mc, D)
    o_ref[...] = o_ref[...] + y.reshape(batch_tile, seq, D)

    # -------- fused final decoder LayerNorm; single HBM writeback --------
    @pl.when((l == n_layers - 1) & (k == n_chunks - 1))
    def _final():
        z = o_ref[...].reshape(Mc, D)
        o_ref[...] = _layernorm(z, normw[...], normb[...]).reshape(
            batch_tile, seq, D)


# ----------------------------------------------------------------------------
# Wrappers
# ----------------------------------------------------------------------------
def mar_decoder_blocks(h, params, cfg):
    """All decoder Blocks + final LayerNorm in one fused pallas_call."""
    B, T, D = h.shape
    depth = cfg["depth"]
    num_heads = cfg["num_heads"]
    blk = params["blocks"]
    Hm = blk["w1"].shape[-1]

    b_tile = cfg.get("batch_tile", B)            # rows handled per grid slice
    hm_tile = cfg.get("mlp_hidden_tile", Hm)     # streamed MLP hidden chunk
    assert B % b_tile == 0 and Hm % hm_tile == 0 and T % 8 == 0
    n_b = B // b_tile
    n_k = Hm // hm_tile
    Mc = b_tile * T

    kern = functools.partial(_decoder_kernel, num_heads=num_heads,
                             head_dim=D // num_heads, batch_tile=b_tile, seq=T)

    per_layer = lambda bi, l, k: (l, 0, 0)       # resident across MLP chunks
    specs_and_args = [
        # Activation: fetched once per batch tile (bf16 halves the DMA).
        (pl.BlockSpec((b_tile, T, D), lambda bi, l, k: (bi, 0, 0)),
         h.astype(jnp.bfloat16)),
        # Stacked (depth, ...) per-layer weights: depth axis squeezed, next
        # layer's slice prefetches under the current layer's compute.
        (pl.BlockSpec((None, 1, D), per_layer), blk["ln1w"]),
        (pl.BlockSpec((None, 1, D), per_layer), blk["ln1b"]),
        (pl.BlockSpec((None, D, 3 * D), per_layer), blk["wqkv"]),
        (pl.BlockSpec((None, 1, 3 * D), per_layer), blk["bqkv"]),
        (pl.BlockSpec((None, D, D), per_layer), blk["wproj"]),
        (pl.BlockSpec((None, 1, D), per_layer), blk["bproj"]),
        (pl.BlockSpec((None, 1, D), per_layer), blk["ln2w"]),
        (pl.BlockSpec((None, 1, D), per_layer), blk["ln2b"]),
        # MLP weights streamed in hm_tile chunks along the last grid axis.
        (pl.BlockSpec((None, D, hm_tile), lambda bi, l, k: (l, 0, k)), blk["w1"]),
        (pl.BlockSpec((None, 1, hm_tile), lambda bi, l, k: (l, 0, k)), blk["b1"]),
        (pl.BlockSpec((None, hm_tile, D), lambda bi, l, k: (l, k, 0)), blk["w2"]),
        (pl.BlockSpec((None, 1, D), per_layer), blk["b2"]),
        # Final decoder_norm params (tiny, invariant across the grid).
        (pl.BlockSpec((1, D), lambda bi, l, k: (0, 0)), params["norm_w"]),
        (pl.BlockSpec((1, D), lambda bi, l, k: (0, 0)), params["norm_b"]),
    ]
    in_specs = [s for s, _ in specs_and_args]
    args = [a for _, a in specs_and_args]

    out = pl.pallas_call(
        kern,
        out_shape=jax.ShapeDtypeStruct((B, T, D), jnp.float32),
        grid_spec=pltpu.PrefetchScalarGridSpec(
            num_scalar_prefetch=0,
            grid=(n_b, depth, n_k),
            in_specs=in_specs,
            # Activation carried in the resident output block (f32).
            out_specs=pl.BlockSpec((b_tile, T, D), lambda bi, l, k: (bi, 0, 0)),
            scratch_shapes=[pltpu.VMEM((Mc, D), jnp.bfloat16),   # per-head ctx
                            pltpu.VMEM((Mc, D), jnp.bfloat16)],  # LN2(x) carry
        ),
        compiler_params=pltpu.CompilerParams(
            dimension_semantics=("parallel", "arbitrary", "arbitrary"),
            vmem_limit_bytes=_vmem_limit_bytes()),
    )(*args)
    return out


def mar_decoder_forward(x, mask, params, cfg):
    """Replicates MARDecoder.forward (eval mode)."""
    B = x.shape[0]
    buf = cfg["buffer_size"]

    # mask_with_buffer = cat([zeros(B, buffer_size), mask], dim=1)
    mask_with_buffer = jnp.concatenate(
        [jnp.zeros((B, buf), mask.dtype), mask], axis=1)          # (B, T)
    keep = mask_with_buffer == 0

    # Scatter x tokens (row-major order) into unmasked slots; masked slots get
    # mask_token.  Assumes each mask row keeps exactly x.shape[1] tokens.
    idx = jnp.clip(jnp.cumsum(keep.astype(jnp.int32), axis=1) - 1, 0, x.shape[1] - 1)
    gathered = jnp.take_along_axis(x, idx[:, :, None], axis=1)    # (B, T, D)
    x_after_pad = jnp.where(keep[:, :, None], gathered, params["mask_token"])

    h = x_after_pad + params["decoder_pos_embed"]                 # (B, T, D)

    # All decoder blocks + final LayerNorm: one fused Pallas kernel.
    h = mar_decoder_blocks(h, params, cfg)

    h = h[:, buf:]                                                # drop buffer tokens
    return h + params["diffusion_pos_embed"]


# ----------------------------------------------------------------------------
# Deterministic parameter init (matches module __init__ shapes / init scheme),
# with per-layer weights stacked along a leading `depth` axis and matmul
# weights stored in bf16 (f32-accumulated in the kernel).
# TODO(synk): on v5e, int8 weights with per-channel scales would halve weight
# DMA and double MXU rate; not done here (v7x has no int MXU path).
# ----------------------------------------------------------------------------
def _xavier_uniform(key, fan_in, fan_out):
    limit = (6.0 / (fan_in + fan_out)) ** 0.5
    return jax.random.uniform(key, (fan_in, fan_out), jnp.float32, -limit, limit)


def init_params(key, cfg):
    D = cfg["dim"]
    Hm = int(cfg["mlp_ratio"] * D)
    T = cfg["seq_len"] + cfg["buffer_size"]
    depth = cfg["depth"]

    keys = iter(jax.random.split(key, 3 + 4 * depth))

    def xav_stack(fan_in, fan_out):
        return jnp.stack([_xavier_uniform(next(keys), fan_in, fan_out)
                          for _ in range(depth)]).astype(jnp.bfloat16)

    params = {
        "mask_token": 0.02 * jax.random.normal(next(keys), (1, 1, D), jnp.float32),
        "decoder_pos_embed": 0.02 * jax.random.normal(next(keys), (1, T, D), jnp.float32),
        "diffusion_pos_embed": 0.02 * jax.random.normal(
            next(keys), (1, cfg["seq_len"], D), jnp.float32),
        "norm_w": jnp.ones((1, D), jnp.float32),
        "norm_b": jnp.zeros((1, D), jnp.float32),
        "blocks": {
            "ln1w": jnp.ones((depth, 1, D), jnp.float32),
            "ln1b": jnp.zeros((depth, 1, D), jnp.float32),
            "wqkv": xav_stack(D, 3 * D),
            "bqkv": jnp.zeros((depth, 1, 3 * D), jnp.float32),
            "wproj": xav_stack(D, D),
            "bproj": jnp.zeros((depth, 1, D), jnp.float32),
            "ln2w": jnp.ones((depth, 1, D), jnp.float32),
            "ln2b": jnp.zeros((depth, 1, D), jnp.float32),
            "w1": xav_stack(D, Hm),
            "b1": jnp.zeros((depth, 1, Hm), jnp.float32),
            "w2": xav_stack(Hm, D),
            "b2": jnp.zeros((depth, 1, D), jnp.float32),
        },
    }
    return params


# ----------------------------------------------------------------------------
if __name__ == "__main__":
    # Small configuration consistent with the module:
    # img_size=64, vae_stride=16, patch_size=1 -> seq_h=seq_w=4, seq_len=16
    cfg = dict(dim=128, depth=2, num_heads=4, mlp_ratio=4.0,
               seq_len=16, buffer_size=8,
               batch_tile=1,          # leading parallel grid axis (2 tiles)
               mlp_hidden_tile=256)   # Hm=512 -> 2 streamed MLP chunks
    B = 2
    D = cfg["dim"]
    seq_len = cfg["seq_len"]
    buf = cfg["buffer_size"]
    num_masked = 10                      # 6 unmasked latent tokens per row
    num_kept = buf + (seq_len - num_masked)

    key = jax.random.PRNGKey(0)
    k_params, k_x, k_mask = jax.random.split(key, 3)

    params = init_params(k_params, cfg)

    # encoder-side tokens that survived masking (buffer tokens + unmasked tokens)
    x = jax.random.normal(k_x, (B, num_kept, D), jnp.float32)

    # deterministic binary mask, exactly `num_masked` ones per row
    rows = []
    for b in range(B):
        perm = jax.random.permutation(jax.random.fold_in(k_mask, b), seq_len)
        rows.append(jnp.zeros((seq_len,), jnp.float32).at[perm[:num_masked]].set(1.0))
    mask = jnp.stack(rows)               # (B, seq_len)

    out = jax.block_until_ready(mar_decoder_forward(x, mask, params, cfg))
    assert out.shape == (B, seq_len, D), out.shape
    assert bool(jnp.all(jnp.isfinite(out)))
    print("KERNEL_OK")
</pallas_src>

<mosaic_0001>
module attributes {stable_mosaic.version = 11 : i64} {
  func.func @_decoder_kernel(%arg0: i32, %arg1: i32, %arg2: i32, %arg3: memref<1x24x128xbf16, #tpu.memory_space<vmem>>, %arg4: memref<1x1x128xf32, #tpu.memory_space<vmem>>, %arg5: memref<1x1x128xf32, #tpu.memory_space<vmem>>, %arg6: memref<1x128x384xbf16, #tpu.memory_space<vmem>>, %arg7: memref<1x1x384xf32, #tpu.memory_space<vmem>>, %arg8: memref<1x128x128xbf16, #tpu.memory_space<vmem>>, %arg9: memref<1x1x128xf32, #tpu.memory_space<vmem>>, %arg10: memref<1x1x128xf32, #tpu.memory_space<vmem>>, %arg11: memref<1x1x128xf32, #tpu.memory_space<vmem>>, %arg12: memref<1x128x256xbf16, #tpu.memory_space<vmem>>, %arg13: memref<1x1x256xf32, #tpu.memory_space<vmem>>, %arg14: memref<1x256x128xbf16, #tpu.memory_space<vmem>>, %arg15: memref<1x1x128xf32, #tpu.memory_space<vmem>>, %arg16: memref<1x128xf32, #tpu.memory_space<vmem>>, %arg17: memref<1x128xf32, #tpu.memory_space<vmem>>, %arg18: memref<1x24x128xf32, #tpu.memory_space<vmem>>, %arg19: memref<24x128xbf16, #tpu.memory_space<vmem>>, %arg20: memref<24x128xbf16, #tpu.memory_space<vmem>>) attributes {dimension_semantics = [#tpu.dimension_semantics<parallel>, #tpu.dimension_semantics<arbitrary>, #tpu.dimension_semantics<arbitrary>], iteration_bounds = array<i64: 2, 2, 2>, scalar_prefetch = 0 : i64, scratch_operands = 2 : i64, tpu.core_type = #tpu.core_type<tc>, window_params = [{transform_indices = @transform_0, window_bounds = array<i64: 1, 24, 128>}, {transform_indices = @transform_1, window_bounds = array<i64: 1, 1, 128>}, {transform_indices = @transform_2, window_bounds = array<i64: 1, 1, 128>}, {transform_indices = @transform_3, window_bounds = array<i64: 1, 128, 384>}, {transform_indices = @transform_4, window_bounds = array<i64: 1, 1, 384>}, {transform_indices = @transform_5, window_bounds = array<i64: 1, 128, 128>}, {transform_indices = @transform_6, window_bounds = array<i64: 1, 1, 128>}, {transform_indices = @transform_7, window_bounds = array<i64: 1, 1, 128>}, {transform_indices = @transform_8, window_bounds = array<i64: 1, 1, 128>}, {transform_indices = @transform_9, window_bounds = array<i64: 1, 128, 256>}, {transform_indices = @transform_10, window_bounds = array<i64: 1, 1, 256>}, {transform_indices = @transform_11, window_bounds = array<i64: 1, 256, 128>}, {transform_indices = @transform_12, window_bounds = array<i64: 1, 1, 128>}, {pipeline_mode = #tpu.pipeline_mode<synchronous>, transform_indices = @transform_13, window_bounds = array<i64: 1, 128>}, {pipeline_mode = #tpu.pipeline_mode<synchronous>, transform_indices = @transform_14, window_bounds = array<i64: 1, 128>}, {transform_indices = @transform_15, window_bounds = array<i64: 1, 24, 128>}]} {
    %c0_i32 = arith.constant 0 : i32
    %0 = arith.cmpi eq, %arg1, %c0_i32 : i32
    %c0_i32_0 = arith.constant 0 : i32
    %1 = arith.cmpi eq, %arg2, %c0_i32_0 : i32
    %2 = arith.andi %0, %1 : i1
    %3 = arith.extui %2 : i1 to i32
    %c0_i32_1 = arith.constant 0 : i32
    %4 = arith.cmpi ne, %3, %c0_i32_1 : i32
    scf.if %4 {
      %c0_27 = arith.constant 0 : index
      %c0_28 = arith.constant 0 : index
      %c0_29 = arith.constant 0 : index
      %42 = vector.load %arg3[%c0_27, %c0_28, %c0_29] : memref<1x24x128xbf16, #tpu.memory_space<vmem>>, vector<1x24x128xbf16>
      %43 = arith.extf %42 : vector<1x24x128xbf16> to vector<1x24x128xf32>
      %c0_30 = arith.constant 0 : index
      %c0_31 = arith.constant 0 : index
      %c0_32 = arith.constant 0 : index
      %44 = vector.load %arg18[%c0_30, %c0_31, %c0_32] : memref<1x24x128xf32, #tpu.memory_space<vmem>>, vector<1x24x128xf32>
      tpu.vector_store %arg18[%c0_30, %c0_31, %c0_32], %43 {strides = array<i32>} : memref<1x24x128xf32, #tpu.memory_space<vmem>>, vector<1x24x128xf32>,
    } else {
    }
    %c0_i32_2 = arith.constant 0 : i32
    %5 = arith.cmpi eq, %arg2, %c0_i32_2 : i32
    %6 = arith.extui %5 : i1 to i32
    %c0_i32_3 = arith.constant 0 : i32
    %7 = arith.cmpi ne, %6, %c0_i32_3 : i32
    scf.if %7 {
      %c0_27 = arith.constant 0 : index
      %c0_28 = arith.constant 0 : index
      %c0_29 = arith.constant 0 : index
      %42 = vector.load %arg18[%c0_27, %c0_28, %c0_29] : memref<1x24x128xf32, #tpu.memory_space<vmem>>, vector<1x24x128xf32>
      %43 = vector.shape_cast %42 : vector<1x24x128xf32> to vector<24x128xf32>
      %c0_30 = arith.constant 0 : index
      %c0_31 = arith.constant 0 : index
      %c0_32 = arith.constant 0 : index
      %44 = vector.load %arg4[%c0_30, %c0_31, %c0_32] : memref<1x1x128xf32, #tpu.memory_space<vmem>>, vector<1x1x128xf32>
      %45 = vector.shape_cast %44 : vector<1x1x128xf32> to vector<1x128xf32>
      %c0_33 = arith.constant 0 : index
      %c0_34 = arith.constant 0 : index
      %c0_35 = arith.constant 0 : index
      %46 = vector.load %arg5[%c0_33, %c0_34, %c0_35] : memref<1x1x128xf32, #tpu.memory_space<vmem>>, vector<1x1x128xf32>
      %47 = vector.shape_cast %46 : vector<1x1x128xf32> to vector<1x128xf32>
      %cst_36 = arith.constant dense<0.000000e+00> : vector<24xf32>
      %48 = vector.multi_reduction <add>, %43, %cst_36 [1] : vector<24x128xf32> to vector<24xf32>
      %49 = vector.shape_cast %48 : vector<24xf32> to vector<24x1xf32>
      %cst_37 = arith.constant 1.280000e+02 : f32
      %50 = vector.broadcast %cst_37 : f32 to vector<24x1xf32>
      %51 = arith.divf %49, %50 : vector<24x1xf32>
      %52 = vector.broadcast %51 : vector<24x1xf32> to vector<24x128xf32>
      %53 = arith.subf %43, %52 : vector<24x128xf32>
      %54 = arith.mulf %53, %53 : vector<24x128xf32>
      %cst_38 = arith.constant dense<0.000000e+00> : vector<24xf32>
      %55 = vector.multi_reduction <add>, %54, %cst_38 [1] : vector<24x128xf32> to vector<24xf32>
      %56 = vector.shape_cast %55 : vector<24xf32> to vector<24x1xf32>
      %cst_39 = arith.constant 1.280000e+02 : f32
      %57 = vector.broadcast %cst_39 : f32 to vector<24x1xf32>
      %58 = arith.divf %56, %57 : vector<24x1xf32>
      %59 = vector.broadcast %51 : vector<24x1xf32> to vector<24x128xf32>
      %60 = arith.subf %43, %59 : vector<24x128xf32>
      %cst_40 = arith.constant 9.99999997E-7 : f32
      %61 = vector.broadcast %cst_40 : f32 to vector<24x1xf32>
      %62 = arith.addf %58, %61 : vector<24x1xf32>
      %63 = math.rsqrt %62 : vector<24x1xf32>
      %64 = vector.broadcast %63 : vector<24x1xf32> to vector<24x128xf32>
      %65 = arith.mulf %60, %64 : vector<24x128xf32>
      %66 = vector.broadcast %45 : vector<1x128xf32> to vector<24x128xf32>
      %67 = arith.mulf %65, %66 : vector<24x128xf32>
      %68 = vector.broadcast %47 : vector<1x128xf32> to vector<24x128xf32>
      %69 = arith.addf %67, %68 : vector<24x128xf32>
      %70 = arith.truncf %69 : vector<24x128xf32> to vector<24x128xbf16>
      %c0_41 = arith.constant 0 : index
      %c0_42 = arith.constant 0 : index
      %c0_43 = arith.constant 0 : index
      %71 = vector.load %arg6[%c0_41, %c0_42, %c0_43] : memref<1x128x384xbf16, #tpu.memory_space<vmem>>, vector<1x128x384xbf16>
      %72 = vector.shape_cast %71 : vector<1x128x384xbf16> to vector<128x384xbf16>
      %cst_44 = arith.constant dense<0.000000e+00> : vector<24x384xf32>
      %73 = tpu.matmul %70, %72, %cst_44 {dimension_numbers = #tpu.dot_dimension_numbers<[1], [0], [0], [1], [0, 0, 1, 1], [], []>} : vector<24x128xbf16>, vector<128x384xbf16>, vector<24x384xf32> -> vector<24x384xf32>
      %c0_45 = arith.constant 0 : index
      %c0_46 = arith.constant 0 : index
      %c0_47 = arith.constant 0 : index
      %74 = vector.load %arg7[%c0_45, %c0_46, %c0_47] : memref<1x1x384xf32, #tpu.memory_space<vmem>>, vector<1x1x384xf32>
      %75 = vector.shape_cast %74 : vector<1x1x384xf32> to vector<1x384xf32>
      %76 = vector.broadcast %75 : vector<1x384xf32> to vector<24x384xf32>
      %77 = arith.addf %73, %76 : vector<24x384xf32>
      %78 = vector.extract_strided_slice %77 {offsets = [0, 0], sizes = [24, 128], strides = [1, 1]} : vector<24x384xf32> to vector<24x128xf32>
      %cst_48 = arith.constant 0.176776692 : f32
      %79 = vector.broadcast %cst_48 : f32 to vector<24x128xf32>
      %80 = arith.mulf %78, %79 : vector<24x128xf32>
      %81 = arith.truncf %80 : vector<24x128xf32> to vector<24x128xbf16>
      %82 = vector.shape_cast %81 : vector<24x128xbf16> to vector<1x24x128xbf16>
      %83 = vector.extract_strided_slice %77 {offsets = [0, 128], sizes = [24, 128], strides = [1, 1]} : vector<24x384xf32> to vector<24x128xf32>
      %84 = arith.truncf %83 : vector<24x128xf32> to vector<24x128xbf16>
      %85 = vector.shape_cast %84 : vector<24x128xbf16> to vector<1x24x128xbf16>
      %86 = vector.extract_strided_slice %77 {offsets = [0, 256], sizes = [24, 128], strides = [1, 1]} : vector<24x384xf32> to vector<24x128xf32>
      %87 = arith.truncf %86 : vector<24x128xf32> to vector<24x128xbf16>
      %88 = vector.shape_cast %87 : vector<24x128xbf16> to vector<1x24x128xbf16>
      %89 = vector.extract_strided_slice %82 {offsets = [0, 0, 0], sizes = [1, 24, 32], strides = [1, 1, 1]} : vector<1x24x128xbf16> to vector<1x24x32xbf16>
      %90 = vector.extract_strided_slice %85 {offsets = [0, 0, 0], sizes = [1, 24, 32], strides = [1, 1, 1]} : vector<1x24x128xbf16> to vector<1x24x32xbf16>
      %91 = vector.extract_strided_slice %88 {offsets = [0, 0, 0], sizes = [1, 24, 32], strides = [1, 1, 1]} : vector<1x24x128xbf16> to vector<1x24x32xbf16>
      "tpu.trace_start"() <{level = 10 : i32, message = "bqd,bkd->bqk"}> : () -> ()
      %cst_49 = arith.constant dense<0.000000e+00> : vector<1x24x24xf32>
      %92 = tpu.matmul %89, %90, %cst_49 {dimension_numbers = #tpu.dot_dimension_numbers<[2], [2], [1], [1], [0, 0, 0, 1, 1, 1], [0], [0]>} : vector<1x24x32xbf16>, vector<1x24x32xbf16>, vector<1x24x24xf32> -> vector<1x24x24xf32>
      "tpu.trace_stop"() : () -> ()
      %cst_50 = arith.constant dense<0xFF800000> : vector<1x24xf32>
      %93 = vector.multi_reduction <maximumf>, %92, %cst_50 [2] : vector<1x24x24xf32> to vector<1x24xf32>
      %94 = vector.shape_cast %93 : vector<1x24xf32> to vector<1x24x1xf32>
      %95 = vector.broadcast %94 : vector<1x24x1xf32> to vector<1x24x24xf32>
      %96 = arith.subf %92, %95 : vector<1x24x24xf32>
      %97 = math.exp %96 : vector<1x24x24xf32>
      %cst_51 = arith.constant dense<0.000000e+00> : vector<1x24xf32>
      %98 = vector.multi_reduction <add>, %97, %cst_51 [2] : vector<1x24x24xf32> to vector<1x24xf32>
      %99 = vector.shape_cast %98 : vector<1x24xf32> to vector<1x24x1xf32>
      %100 = tpu.reciprocal %99 {approx = true} : vector<1x24x1xf32> -> vector<1x24x1xf32>
      %101 = vector.broadcast %100 : vector<1x24x1xf32> to vector<1x24x24xf32>
      %102 = arith.mulf %97, %101 : vector<1x24x24xf32>
      %103 = arith.truncf %102 : vector<1x24x24xf32> to vector<1x24x24xbf16>
      "tpu.trace_start"() <{level = 10 : i32, message = "bqk,bkd->bqd"}> : () -> ()
      %cst_52 = arith.constant dense<0.000000e+00> : vector<1x24x32xf32>
      %104 = tpu.matmul %103, %91, %cst_52 {dimension_numbers = #tpu.dot_dimension_numbers<[2], [1], [1], [2], [0, 0, 0, 1, 1, 2], [0], [0]>} : vector<1x24x24xbf16>, vector<1x24x32xbf16>, vector<1x24x32xf32> -> vector<1x24x32xf32>
      "tpu.trace_stop"() : () -> ()
      %105 = vector.shape_cast %104 : vector<1x24x32xf32> to vector<24x32xf32>
      %106 = arith.truncf %105 : vector<24x32xf32> to vector<24x32xbf16>
      %c0_53 = arith.constant 0 : index
      %c0_54 = arith.constant 0 : index
      %107 = vector.load %arg19[%c0_53, %c0_54] : memref<24x128xbf16, #tpu.memory_space<vmem>>, vector<24x32xbf16>
      tpu.vector_store %arg19[%c0_53, %c0_54], %106 {strides = array<i32>} : memref<24x128xbf16, #tpu.memory_space<vmem>>, vector<24x32xbf16>,
      %108 = vector.extract_strided_slice %82 {offsets = [0, 0, 32], sizes = [1, 24, 32], strides = [1, 1, 1]} : vector<1x24x128xbf16> to vector<1x24x32xbf16>
      %109 = vector.extract_strided_slice %85 {offsets = [0, 0, 32], sizes = [1, 24, 32], strides = [1, 1, 1]} : vector<1x24x128xbf16> to vector<1x24x32xbf16>
      %110 = vector.extract_strided_slice %88 {offsets = [0, 0, 32], sizes = [1, 24, 32], strides = [1, 1, 1]} : vector<1x24x128xbf16> to vector<1x24x32xbf16>
      "tpu.trace_start"() <{level = 10 : i32, message = "bqd,bkd->bqk"}> : () -> ()
      %cst_55 = arith.constant dense<0.000000e+00> : vector<1x24x24xf32>
      %111 = tpu.matmul %108, %109, %cst_55 {dimension_numbers = #tpu.dot_dimension_numbers<[2], [2], [1], [1], [0, 0, 0, 1, 1, 1], [0], [0]>} : vector<1x24x32xbf16>, vector<1x24x32xbf16>, vector<1x24x24xf32> -> vector<1x24x24xf32>
      "tpu.trace_stop"() : () -> ()
      %cst_56 = arith.constant dense<0xFF800000> : vector<1x24xf32>
      %112 = vector.multi_reduction <maximumf>, %111, %cst_56 [2] : vector<1x24x24xf32> to vector<1x24xf32>
      %113 = vector.shape_cast %112 : vector<1x24xf32> to vector<1x24x1xf32>
      %114 = vector.broadcast %113 : vector<1x24x1xf32> to vector<1x24x24xf32>
      %115 = arith.subf %111, %114 : vector<1x24x24xf32>
      %116 = math.exp %115 : vector<1x24x24xf32>
      %cst_57 = arith.constant dense<0.000000e+00> : vector<1x24xf32>
      %117 = vector.multi_reduction <add>, %116, %cst_57 [2] : vector<1x24x24xf32> to vector<1x24xf32>
      %118 = vector.shape_cast %117 : vector<1x24xf32> to vector<1x24x1xf32>
      %119 = tpu.reciprocal %118 {approx = true} : vector<1x24x1xf32> -> vector<1x24x1xf32>
      %120 = vector.broadcast %119 : vector<1x24x1xf32> to vector<1x24x24xf32>
      %121 = arith.mulf %116, %120 : vector<1x24x24xf32>
      %122 = arith.truncf %121 : vector<1x24x24xf32> to vector<1x24x24xbf16>
      "tpu.trace_start"() <{level = 10 : i32, message = "bqk,bkd->bqd"}> : () -> ()
      %cst_58 = arith.constant dense<0.000000e+00> : vector<1x24x32xf32>
      %123 = tpu.matmul %122, %110, %cst_58 {dimension_numbers = #tpu.dot_dimension_numbers<[2], [1], [1], [2], [0, 0, 0, 1, 1, 2], [0], [0]>} : vector<1x24x24xbf16>, vector<1x24x32xbf16>, vector<1x24x32xf32> -> vector<1x24x32xf32>
      "tpu.trace_stop"() : () -> ()
      %124 = vector.shape_cast %123 : vector<1x24x32xf32> to vector<24x32xf32>
      %125 = arith.truncf %124 : vector<24x32xf32> to vector<24x32xbf16>
      %c0_59 = arith.constant 0 : index
      %c32 = arith.constant 32 : index
      %126 = vector.load %arg19[%c0_59, %c32] : memref<24x128xbf16, #tpu.memory_space<vmem>>, vector<24x32xbf16>
      tpu.vector_store %arg19[%c0_59, %c32], %125 {strides = array<i32>} : memref<24x128xbf16, #tpu.memory_space<vmem>>, vector<24x32xbf16>,
      %127 = vector.extract_strided_slice %82 {offsets = [0, 0, 64], sizes = [1, 24, 32], strides = [1, 1, 1]} : vector<1x24x128xbf16> to vector<1x24x32xbf16>
      %128 = vector.extract_strided_slice %85 {offsets = [0, 0, 64], sizes = [1, 24, 32], strides = [1, 1, 1]} : vector<1x24x128xbf16> to vector<1x24x32xbf16>
      %129 = vector.extract_strided_slice %88 {offsets = [0, 0, 64], sizes = [1, 24, 32], strides = [1, 1, 1]} : vector<1x24x128xbf16> to vector<1x24x32xbf16>
      "tpu.trace_start"() <{level = 10 : i32, message = "bqd,bkd->bqk"}> : () -> ()
      %cst_60 = arith.constant dense<0.000000e+00> : vector<1x24x24xf32>
      %130 = tpu.matmul %127, %128, %cst_60 {dimension_numbers = #tpu.dot_dimension_numbers<[2], [2], [1], [1], [0, 0, 0, 1, 1, 1], [0], [0]>} : vector<1x24x32xbf16>, vector<1x24x32xbf16>, vector<1x24x24xf32> -> vector<1x24x24xf32>
      "tpu.trace_stop"() : () -> ()
      %cst_61 = arith.constant dense<0xFF800000> : vector<1x24xf32>
      %131 = vector.multi_reduction <maximumf>, %130, %cst_61 [2] : vector<1x24x24xf32> to vector<1x24xf32>
      %132 = vector.shape_cast %131 : vector<1x24xf32> to vector<1x24x1xf32>
      %133 = vector.broadcast %132 : vector<1x24x1xf32> to vector<1x24x24xf32>
      %134 = arith.subf %130, %133 : vector<1x24x24xf32>
      %135 = math.exp %134 : vector<1x24x24xf32>
      %cst_62 = arith.constant dense<0.000000e+00> : vector<1x24xf32>
      %136 = vector.multi_reduction <add>, %135, %cst_62 [2] : vector<1x24x24xf32> to vector<1x24xf32>
      %137 = vector.shape_cast %136 : vector<1x24xf32> to vector<1x24x1xf32>
      %138 = tpu.reciprocal %137 {approx = true} : vector<1x24x1xf32> -> vector<1x24x1xf32>
      %139 = vector.broadcast %138 : vector<1x24x1xf32> to vector<1x24x24xf32>
      %140 = arith.mulf %135, %139 : vector<1x24x24xf32>
      %141 = arith.truncf %140 : vector<1x24x24xf32> to vector<1x24x24xbf16>
      "tpu.trace_start"() <{level = 10 : i32, message = "bqk,bkd->bqd"}> : () -> ()
      %cst_63 = arith.constant dense<0.000000e+00> : vector<1x24x32xf32>
      %142 = tpu.matmul %141, %129, %cst_63 {dimension_numbers = #tpu.dot_dimension_numbers<[2], [1], [1], [2], [0, 0, 0, 1, 1, 2], [0], [0]>} : vector<1x24x24xbf16>, vector<1x24x32xbf16>, vector<1x24x32xf32> -> vector<1x24x32xf32>
      "tpu.trace_stop"() : () -> ()
      %143 = vector.shape_cast %142 : vector<1x24x32xf32> to vector<24x32xf32>
      %144 = arith.truncf %143 : vector<24x32xf32> to vector<24x32xbf16>
      %c0_64 = arith.constant 0 : index
      %c64 = arith.constant 64 : index
      %145 = vector.load %arg19[%c0_64, %c64] : memref<24x128xbf16, #tpu.memory_space<vmem>>, vector<24x32xbf16>
      tpu.vector_store %arg19[%c0_64, %c64], %144 {strides = array<i32>} : memref<24x128xbf16, #tpu.memory_space<vmem>>, vector<24x32xbf16>,
      %146 = vector.extract_strided_slice %82 {offsets = [0, 0, 96], sizes = [1, 24, 32], strides = [1, 1, 1]} : vector<1x24x128xbf16> to vector<1x24x32xbf16>
      %147 = vector.extract_strided_slice %85 {offsets = [0, 0, 96], sizes = [1, 24, 32], strides = [1, 1, 1]} : vector<1x24x128xbf16> to vector<1x24x32xbf16>
      %148 = vector.extract_strided_slice %88 {offsets = [0, 0, 96], sizes = [1, 24, 32], strides = [1, 1, 1]} : vector<1x24x128xbf16> to vector<1x24x32xbf16>
      "tpu.trace_start"() <{level = 10 : i32, message = "bqd,bkd->bqk"}> : () -> ()
      %cst_65 = arith.constant dense<0.000000e+00> : vector<1x24x24xf32>
      %149 = tpu.matmul %146, %147, %cst_65 {dimension_numbers = #tpu.dot_dimension_numbers<[2], [2], [1], [1], [0, 0, 0, 1, 1, 1], [0], [0]>} : vector<1x24x32xbf16>, vector<1x24x32xbf16>, vector<1x24x24xf32> -> vector<1x24x24xf32>
      "tpu.trace_stop"() : () -> ()
      %cst_66 = arith.constant dense<0xFF800000> : vector<1x24xf32>
      %150 = vector.multi_reduction <maximumf>, %149, %cst_66 [2] : vector<1x24x24xf32> to vector<1x24xf32>
      %151 = vector.shape_cast %150 : vector<1x24xf32> to vector<1x24x1xf32>
      %152 = vector.broadcast %151 : vector<1x24x1xf32> to vector<1x24x24xf32>
      %153 = arith.subf %149, %152 : vector<1x24x24xf32>
      %154 = math.exp %153 : vector<1x24x24xf32>
      %cst_67 = arith.constant dense<0.000000e+00> : vector<1x24xf32>
      %155 = vector.multi_reduction <add>, %154, %cst_67 [2] : vector<1x24x24xf32> to vector<1x24xf32>
      %156 = vector.shape_cast %155 : vector<1x24xf32> to vector<1x24x1xf32>
      %157 = tpu.reciprocal %156 {approx = true} : vector<1x24x1xf32> -> vector<1x24x1xf32>
      %158 = vector.broadcast %157 : vector<1x24x1xf32> to vector<1x24x24xf32>
      %159 = arith.mulf %154, %158 : vector<1x24x24xf32>
      %160 = arith.truncf %159 : vector<1x24x24xf32> to vector<1x24x24xbf16>
      "tpu.trace_start"() <{level = 10 : i32, message = "bqk,bkd->bqd"}> : () -> ()
      %cst_68 = arith.constant dense<0.000000e+00> : vector<1x24x32xf32>
      %161 = tpu.matmul %160, %148, %cst_68 {dimension_numbers = #tpu.dot_dimension_numbers<[2], [1], [1], [2], [0, 0, 0, 1, 1, 2], [0], [0]>} : vector<1x24x24xbf16>, vector<1x24x32xbf16>, vector<1x24x32xf32> -> vector<1x24x32xf32>
      "tpu.trace_stop"() : () -> ()
      %162 = vector.shape_cast %161 : vector<1x24x32xf32> to vector<24x32xf32>
      %163 = arith.truncf %162 : vector<24x32xf32> to vector<24x32xbf16>
      %c0_69 = arith.constant 0 : index
      %c96 = arith.constant 96 : index
      %164 = vector.load %arg19[%c0_69, %c96] : memref<24x128xbf16, #tpu.memory_space<vmem>>, vector<24x32xbf16>
      tpu.vector_store %arg19[%c0_69, %c96], %163 {strides = array<i32>} : memref<24x128xbf16, #tpu.memory_space<vmem>>, vector<24x32xbf16>,
      %c0_70 = arith.constant 0 : index
      %c0_71 = arith.constant 0 : index
      %165 = vector.load %arg19[%c0_70, %c0_71] : memref<24x128xbf16, #tpu.memory_space<vmem>>, vector<24x128xbf16>
      %c0_72 = arith.constant 0 : index
      %c0_73 = arith.constant 0 : index
      %c0_74 = arith.constant 0 : index
      %166 = vector.load %arg8[%c0_72, %c0_73, %c0_74] : memref<1x128x128xbf16, #tpu.memory_space<vmem>>, vector<1x128x128xbf16>
      %167 = vector.shape_cast %166 : vector<1x128x128xbf16> to vector<128x128xbf16>
      %cst_75 = arith.constant dense<0.000000e+00> : vector<24x128xf32>
      %168 = tpu.matmul %165, %167, %cst_75 {dimension_numbers = #tpu.dot_dimension_numbers<[1], [0], [0], [1], [0, 0, 1, 1], [], []>} : vector<24x128xbf16>, vector<128x128xbf16>, vector<24x128xf32> -> vector<24x128xf32>
      %169 = arith.addf %43, %168 : vector<24x128xf32>
      %c0_76 = arith.constant 0 : index
      %c0_77 = arith.constant 0 : index
      %c0_78 = arith.constant 0 : index
      %170 = vector.load %arg9[%c0_76, %c0_77, %c0_78] : memref<1x1x128xf32, #tpu.memory_space<vmem>>, vector<1x1x128xf32>
      %171 = vector.shape_cast %170 : vector<1x1x128xf32> to vector<1x128xf32>
      %172 = vector.broadcast %171 : vector<1x128xf32> to vector<24x128xf32>
      %173 = arith.addf %169, %172 : vector<24x128xf32>
      %c0_79 = arith.constant 0 : index
      %c0_80 = arith.constant 0 : index
      %c0_81 = arith.constant 0 : index
      %174 = vector.load %arg15[%c0_79, %c0_80, %c0_81] : memref<1x1x128xf32, #tpu.memory_space<vmem>>, vector<1x1x128xf32>
      %175 = vector.shape_cast %174 : vector<1x1x128xf32> to vector<1x128xf32>
      %176 = vector.broadcast %175 : vector<1x128xf32> to vector<24x128xf32>
      %177 = arith.addf %173, %176 : vector<24x128xf32>
      %c0_82 = arith.constant 0 : index
      %c0_83 = arith.constant 0 : index
      %c0_84 = arith.constant 0 : index
      %178 = vector.load %arg10[%c0_82, %c0_83, %c0_84] : memref<1x1x128xf32, #tpu.memory_space<vmem>>, vector<1x1x128xf32>
      %179 = vector.shape_cast %178 : vector<1x1x128xf32> to vector<1x128xf32>
      %c0_85 = arith.constant 0 : index
      %c0_86 = arith.constant 0 : index
      %c0_87 = arith.constant 0 : index
      %180 = vector.load %arg11[%c0_85, %c0_86, %c0_87] : memref<1x1x128xf32, #tpu.memory_space<vmem>>, vector<1x1x128xf32>
      %181 = vector.shape_cast %180 : vector<1x1x128xf32> to vector<1x128xf32>
      %cst_88 = arith.constant dense<0.000000e+00> : vector<24xf32>
      %182 = vector.multi_reduction <add>, %177, %cst_88 [1] : vector<24x128xf32> to vector<24xf32>
      %183 = vector.shape_cast %182 : vector<24xf32> to vector<24x1xf32>
      %cst_89 = arith.constant 1.280000e+02 : f32
      %184 = vector.broadcast %cst_89 : f32 to vector<24x1xf32>
      %185 = arith.divf %183, %184 : vector<24x1xf32>
      %186 = vector.broadcast %185 : vector<24x1xf32> to vector<24x128xf32>
      %187 = arith.subf %177, %186 : vector<24x128xf32>
      %188 = arith.mulf %187, %187 : vector<24x128xf32>
      %cst_90 = arith.constant dense<0.000000e+00> : vector<24xf32>
      %189 = vector.multi_reduction <add>, %188, %cst_90 [1] : vector<24x128xf32> to vector<24xf32>
      %190 = vector.shape_cast %189 : vector<24xf32> to vector<24x1xf32>
      %cst_91 = arith.constant 1.280000e+02 : f32
      %191 = vector.broadcast %cst_91 : f32 to vector<24x1xf32>
      %192 = arith.divf %190, %191 : vector<24x1xf32>
      %193 = vector.broadcast %185 : vector<24x1xf32> to vector<24x128xf32>
      %194 = arith.subf %177, %193 : vector<24x128xf32>
      %cst_92 = arith.constant 9.99999997E-7 : f32
      %195 = vector.broadcast %cst_92 : f32 to vector<24x1xf32>
      %196 = arith.addf %192, %195 : vector<24x1xf32>
      %197 = math.rsqrt %196 : vector<24x1xf32>
      %198 = vector.broadcast %197 : vector<24x1xf32> to vector<24x128xf32>
      %199 = arith.mulf %194, %198 : vector<24x128xf32>
      %200 = vector.broadcast %179 : vector<1x128xf32> to vector<24x128xf32>
      %201 = arith.mulf %199, %200 : vector<24x128xf32>
      %202 = vector.broadcast %181 : vector<1x128xf32> to vector<24x128xf32>
      %203 = arith.addf %201, %202 : vector<24x128xf32>
      %204 = arith.truncf %203 : vector<24x128xf32> to vector<24x128xbf16>
      %c0_93 = arith.constant 0 : index
      %c0_94 = arith.constant 0 : index
      %205 = vector.load %arg20[%c0_93, %c0_94] : memref<24x128xbf16, #tpu.memory_space<vmem>>, vector<24x128xbf16>
      tpu.vector_store %arg20[%c0_93, %c0_94], %204 {strides = array<i32>} : memref<24x128xbf16, #tpu.memory_space<vmem>>, vector<24x128xbf16>,
      %206 = vector.shape_cast %177 : vector<24x128xf32> to vector<1x24x128xf32>
      %c0_95 = arith.constant 0 : index
      %c0_96 = arith.constant 0 : index
      %c0_97 = arith.constant 0 : index
      %207 = vector.load %arg18[%c0_95, %c0_96, %c0_97] : memref<1x24x128xf32, #tpu.memory_space<vmem>>, vector<1x24x128xf32>
      tpu.vector_store %arg18[%c0_95, %c0_96, %c0_97], %206 {strides = array<i32>} : memref<1x24x128xf32, #tpu.memory_space<vmem>>, vector<1x24x128xf32>,
    } else {
    }
    %c0 = arith.constant 0 : index
    %c0_4 = arith.constant 0 : index
    %8 = vector.load %arg20[%c0, %c0_4] : memref<24x128xbf16, #tpu.memory_space<vmem>>, vector<24x128xbf16>
    %c0_5 = arith.constant 0 : index
    %c0_6 = arith.constant 0 : index
    %c0_7 = arith.constant 0 : index
    %9 = vector.load %arg12[%c0_5, %c0_6, %c0_7] : memref<1x128x256xbf16, #tpu.memory_space<vmem>>, vector<1x128x256xbf16>
    %10 = vector.shape_cast %9 : vector<1x128x256xbf16> to vector<128x256xbf16>
    %cst = arith.constant dense<0.000000e+00> : vector<24x256xf32>
    %11 = tpu.matmul %8, %10, %cst {dimension_numbers = #tpu.dot_dimension_numbers<[1], [0], [0], [1], [0, 0, 1, 1], [], []>} : vector<24x128xbf16>, vector<128x256xbf16>, vector<24x256xf32> -> vector<24x256xf32>
    %c0_8 = arith.constant 0 : index
    %c0_9 = arith.constant 0 : index
    %c0_10 = arith.constant 0 : index
    %12 = vector.load %arg13[%c0_8, %c0_9, %c0_10] : memref<1x1x256xf32, #tpu.memory_space<vmem>>, vector<1x1x256xf32>
    %13 = vector.shape_cast %12 : vector<1x1x256xf32> to vector<1x256xf32>
    %14 = vector.broadcast %13 : vector<1x256xf32> to vector<24x256xf32>
    %15 = arith.addf %11, %14 : vector<24x256xf32>
    %16 = arith.mulf %15, %15 : vector<24x256xf32>
    %17 = arith.mulf %15, %16 : vector<24x256xf32>
    %cst_11 = arith.constant 4.471500e-02 : f32
    %18 = vector.broadcast %cst_11 : f32 to vector<24x256xf32>
    %19 = arith.mulf %18, %17 : vector<24x256xf32>
    %20 = arith.addf %15, %19 : vector<24x256xf32>
    %cst_12 = arith.constant 0.797884583 : f32
    %21 = vector.broadcast %cst_12 : f32 to vector<24x256xf32>
    %22 = arith.mulf %21, %20 : vector<24x256xf32>
    %23 = math.tanh %22 : vector<24x256xf32>
    %cst_13 = arith.constant 1.000000e+00 : f32
    %24 = vector.broadcast %cst_13 : f32 to vector<24x256xf32>
    %25 = arith.addf %24, %23 : vector<24x256xf32>
    %cst_14 = arith.constant 5.000000e-01 : f32
    %26 = vector.broadcast %cst_14 : f32 to vector<24x256xf32>
    %27 = arith.mulf %26, %25 : vector<24x256xf32>
    %28 = arith.mulf %15, %27 : vector<24x256xf32>
    %29 = arith.truncf %28 : vector<24x256xf32> to vector<24x256xbf16>
    %c0_15 = arith.constant 0 : index
    %c0_16 = arith.constant 0 : index
    %c0_17 = arith.constant 0 : index
    %30 = vector.load %arg14[%c0_15, %c0_16, %c0_17] : memref<1x256x128xbf16, #tpu.memory_space<vmem>>, vector<1x256x128xbf16>
    %31 = vector.shape_cast %30 : vector<1x256x128xbf16> to vector<256x128xbf16>
    %cst_18 = arith.constant dense<0.000000e+00> : vector<24x128xf32>
    %32 = tpu.matmul %29, %31, %cst_18 {dimension_numbers = #tpu.dot_dimension_numbers<[1], [0], [0], [1], [0, 0, 1, 1], [], []>} : vector<24x256xbf16>, vector<256x128xbf16>, vector<24x128xf32> -> vector<24x128xf32>
    %c0_19 = arith.constant 0 : index
    %c0_20 = arith.constant 0 : index
    %c0_21 = arith.constant 0 : index
    %33 = vector.load %arg18[%c0_19, %c0_20, %c0_21] : memref<1x24x128xf32, #tpu.memory_space<vmem>>, vector<1x24x128xf32>
    %34 = vector.shape_cast %32 : vector<24x128xf32> to vector<1x24x128xf32>
    %35 = arith.addf %33, %34 : vector<1x24x128xf32>
    %c0_22 = arith.constant 0 : index
    %c0_23 = arith.constant 0 : index
    %c0_24 = arith.constant 0 : index
    %36 = vector.load %arg18[%c0_22, %c0_23, %c0_24] : memref<1x24x128xf32, #tpu.memory_space<vmem>>, vector<1x24x128xf32>
    tpu.vector_store %arg18[%c0_22, %c0_23, %c0_24], %35 {strides = array<i32>} : memref<1x24x128xf32, #tpu.memory_space<vmem>>, vector<1x24x128xf32>,
    %c1_i32 = arith.constant 1 : i32
    %37 = arith.cmpi eq, %arg1, %c1_i32 : i32
    %c1_i32_25 = arith.constant 1 : i32
    %38 = arith.cmpi eq, %arg2, %c1_i32_25 : i32
    %39 = arith.andi %37, %38 : i1
    %40 = arith.extui %39 : i1 to i32
    %c0_i32_26 = arith.constant 0 : i32
    %41 = arith.cmpi ne, %40, %c0_i32_26 : i32
    scf.if %41 {
      %c0_27 = arith.constant 0 : index
      %c0_28 = arith.constant 0 : index
      %c0_29 = arith.constant 0 : index
      %42 = vector.load %arg18[%c0_27, %c0_28, %c0_29] : memref<1x24x128xf32, #tpu.memory_space<vmem>>, vector<1x24x128xf32>
      %43 = vector.shape_cast %42 : vector<1x24x128xf32> to vector<24x128xf32>
      %c0_30 = arith.constant 0 : index
      %c0_31 = arith.constant 0 : index
      %44 = vector.load %arg16[%c0_30, %c0_31] : memref<1x128xf32, #tpu.memory_space<vmem>>, vector<1x128xf32>
      %c0_32 = arith.constant 0 : index
      %c0_33 = arith.constant 0 : index
      %45 = vector.load %arg17[%c0_32, %c0_33] : memref<1x128xf32, #tpu.memory_space<vmem>>, vector<1x128xf32>
      %cst_34 = arith.constant dense<0.000000e+00> : vector<24xf32>
      %46 = vector.multi_reduction <add>, %43, %cst_34 [1] : vector<24x128xf32> to vector<24xf32>
      %47 = vector.shape_cast %46 : vector<24xf32> to vector<24x1xf32>
      %cst_35 = arith.constant 1.280000e+02 : f32
      %48 = vector.broadcast %cst_35 : f32 to vector<24x1xf32>
      %49 = arith.divf %47, %48 : vector<24x1xf32>
      %50 = vector.broadcast %49 : vector<24x1xf32> to vector<24x128xf32>
      %51 = arith.subf %43, %50 : vector<24x128xf32>
      %52 = arith.mulf %51, %51 : vector<24x128xf32>
      %cst_36 = arith.constant dense<0.000000e+00> : vector<24xf32>
      %53 = vector.multi_reduction <add>, %52, %cst_36 [1] : vector<24x128xf32> to vector<24xf32>
      %54 = vector.shape_cast %53 : vector<24xf32> to vector<24x1xf32>
      %cst_37 = arith.constant 1.280000e+02 : f32
      %55 = vector.broadcast %cst_37 : f32 to vector<24x1xf32>
      %56 = arith.divf %54, %55 : vector<24x1xf32>
      %57 = vector.broadcast %49 : vector<24x1xf32> to vector<24x128xf32>
      %58 = arith.subf %43, %57 : vector<24x128xf32>
      %cst_38 = arith.constant 9.99999997E-7 : f32
      %59 = vector.broadcast %cst_38 : f32 to vector<24x1xf32>
      %60 = arith.addf %56, %59 : vector<24x1xf32>
      %61 = math.rsqrt %60 : vector<24x1xf32>
      %62 = vector.broadcast %61 : vector<24x1xf32> to vector<24x128xf32>
      %63 = arith.mulf %58, %62 : vector<24x128xf32>
      %64 = vector.broadcast %44 : vector<1x128xf32> to vector<24x128xf32>
      %65 = arith.mulf %63, %64 : vector<24x128xf32>
      %66 = vector.broadcast %45 : vector<1x128xf32> to vector<24x128xf32>
      %67 = arith.addf %65, %66 : vector<24x128xf32>
      %68 = vector.shape_cast %67 : vector<24x128xf32> to vector<1x24x128xf32>
      %c0_39 = arith.constant 0 : index
      %c0_40 = arith.constant 0 : index
      %c0_41 = arith.constant 0 : index
      %69 = vector.load %arg18[%c0_39, %c0_40, %c0_41] : memref<1x24x128xf32, #tpu.memory_space<vmem>>, vector<1x24x128xf32>
      tpu.vector_store %arg18[%c0_39, %c0_40, %c0_41], %68 {strides = array<i32>} : memref<1x24x128xf32, #tpu.memory_space<vmem>>, vector<1x24x128xf32>,
    } else {
    }
    return
  }
  func.func @transform_0(%arg0: i32, %arg1: i32, %arg2: i32) -> (i32, i32, i32) {
    %c0_i32 = arith.constant 0 : i32
    %c0_i32_0 = arith.constant 0 : i32
    %c0_i32_1 = arith.constant 0 : i32
    return %arg0, %c0_i32, %c0_i32_0 : i32, i32, i32
  }
  func.func @transform_1(%arg0: i32, %arg1: i32, %arg2: i32) -> (i32, i32, i32) {
    %c0_i32 = arith.constant 0 : i32
    %c0_i32_0 = arith.constant 0 : i32
    %c0_i32_1 = arith.constant 0 : i32
    return %arg1, %c0_i32, %c0_i32_0 : i32, i32, i32
  }
  func.func @transform_2(%arg0: i32, %arg1: i32, %arg2: i32) -> (i32, i32, i32) {
    %c0_i32 = arith.constant 0 : i32
    %c0_i32_0 = arith.constant 0 : i32
    %c0_i32_1 = arith.constant 0 : i32
    return %arg1, %c0_i32, %c0_i32_0 : i32, i32, i32
  }
  func.func @transform_3(%arg0: i32, %arg1: i32, %arg2: i32) -> (i32, i32, i32) {
    %c0_i32 = arith.constant 0 : i32
    %c0_i32_0 = arith.constant 0 : i32
    %c0_i32_1 = arith.constant 0 : i32
    return %arg1, %c0_i32, %c0_i32_0 : i32, i32, i32
  }
  func.func @transform_4(%arg0: i32, %arg1: i32, %arg2: i32) -> (i32, i32, i32) {
    %c0_i32 = arith.constant 0 : i32
    %c0_i32_0 = arith.constant 0 : i32
    %c0_i32_1 = arith.constant 0 : i32
    return %arg1, %c0_i32, %c0_i32_0 : i32, i32, i32
  }
  func.func @transform_5(%arg0: i32, %arg1: i32, %arg2: i32) -> (i32, i32, i32) {
    %c0_i32 = arith.constant 0 : i32
    %c0_i32_0 = arith.constant 0 : i32
    %c0_i32_1 = arith.constant 0 : i32
    return %arg1, %c0_i32, %c0_i32_0 : i32, i32, i32
  }
  func.func @transform_6(%arg0: i32, %arg1: i32, %arg2: i32) -> (i32, i32, i32) {
    %c0_i32 = arith.constant 0 : i32
    %c0_i32_0 = arith.constant 0 : i32
    %c0_i32_1 = arith.constant 0 : i32
    return %arg1, %c0_i32, %c0_i32_0 : i32, i32, i32
  }
  func.func @transform_7(%arg0: i32, %arg1: i32, %arg2: i32) -> (i32, i32, i32) {
    %c0_i32 = arith.constant 0 : i32
    %c0_i32_0 = arith.constant 0 : i32
    %c0_i32_1 = arith.constant 0 : i32
    return %arg1, %c0_i32, %c0_i32_0 : i32, i32, i32
  }
  func.func @transform_8(%arg0: i32, %arg1: i32, %arg2: i32) -> (i32, i32, i32) {
    %c0_i32 = arith.constant 0 : i32
    %c0_i32_0 = arith.constant 0 : i32
    %c0_i32_1 = arith.constant 0 : i32
    return %arg1, %c0_i32, %c0_i32_0 : i32, i32, i32
  }
  func.func @transform_9(%arg0: i32, %arg1: i32, %arg2: i32) -> (i32, i32, i32) {
    %c0_i32 = arith.constant 0 : i32
    %c0_i32_0 = arith.constant 0 : i32
    return %arg1, %c0_i32, %arg2 : i32, i32, i32
  }
  func.func @transform_10(%arg0: i32, %arg1: i32, %arg2: i32) -> (i32, i32, i32) {
    %c0_i32 = arith.constant 0 : i32
    %c0_i32_0 = arith.constant 0 : i32
    return %arg1, %c0_i32, %arg2 : i32, i32, i32
  }
  func.func @transform_11(%arg0: i32, %arg1: i32, %arg2: i32) -> (i32, i32, i32) {
    %c0_i32 = arith.constant 0 : i32
    %c0_i32_0 = arith.constant 0 : i32
    return %arg1, %arg2, %c0_i32 : i32, i32, i32
  }
  func.func @transform_12(%arg0: i32, %arg1: i32, %arg2: i32) -> (i32, i32, i32) {
    %c0_i32 = arith.constant 0 : i32
    %c0_i32_0 = arith.constant 0 : i32
    %c0_i32_1 = arith.constant 0 : i32
    return %arg1, %c0_i32, %c0_i32_0 : i32, i32, i32
  }
  func.func @transform_13(%arg0: i32, %arg1: i32, %arg2: i32) -> (i32, i32) {
    %c0_i32 = arith.constant 0 : i32
    %c0_i32_0 = arith.constant 0 : i32
    %c0_i32_1 = arith.constant 0 : i32
    return %c0_i32, %c0_i32_0 : i32, i32
  }
  func.func @transform_14(%arg0: i32, %arg1: i32, %arg2: i32) -> (i32, i32) {
    %c0_i32 = arith.constant 0 : i32
    %c0_i32_0 = arith.constant 0 : i32
    %c0_i32_1 = arith.constant 0 : i32
    return %c0_i32, %c0_i32_0 : i32, i32
  }
  func.func @transform_15(%arg0: i32, %arg1: i32, %arg2: i32) -> (i32, i32, i32) {
    %c0_i32 = arith.constant 0 : i32
    %c0_i32_0 = arith.constant 0 : i32
    %c0_i32_1 = arith.constant 0 : i32
    return %arg0, %c0_i32, %c0_i32_0 : i32, i32, i32
  }
}

</mosaic_0001>

<bundles_post_ra>
// kernel: tpu_custom_call.1
= control target key start
LH: loop header
LB: loop body
LE: loop exit
PB: predicated region body
PF: predicated region fallthrough
CT: control target
= control target key end

     0   :  { %s5123_s0 = inlined_call_operand.hbm [shape: bf16[2,24,128], index: 0, kind: input, shape index: {}]   ;;  %s5124_s1 = inlined_call_operand.hbm [shape: f32[2,1,128], index: 1, kind: input, shape index: {}]   ;;  %s5125_s2 = inlined_call_operand.hbm [shape: f32[2,1,128], index: 2, kind: input, shape index: {}]   ;;  %s5126_s3 = inlined_call_operand.hbm [shape: bf16[2,128,384], index: 3, kind: input, shape index: {}]   ;;  %s5127_s4 = inlined_call_operand.vmem [shape: f32[2,1,384], index: 4, kind: input, shape index: {}]   ;;  %s5128_s5 = inlined_call_operand.hbm [shape: bf16[2,128,128], index: 5, kind: input, shape index: {}]   ;;  %s5129_s6 = inlined_call_operand.vmem [shape: f32[2,1,128], index: 6, kind: input, shape index: {}]   ;;  %s5130_s7 = inlined_call_operand.hbm [shape: f32[2,1,128], index: 7, kind: input, shape index: {}]   ;;  %s5131_s8 = inlined_call_operand.hbm [shape: f32[2,1,128], index: 8, kind: input, shape index: {}]   ;;  %s5132_s9 = inlined_call_operand.hbm [shape: bf16[2,128,512], index: 9, kind: input, shape index: {}]   ;;  %s5133_s10 = inlined_call_operand.vmem [shape: f32[2,1,512], index: 10, kind: input, shape index: {}]   ;;  %s5134_s11 = inlined_call_operand.hbm [shape: bf16[2,512,128], index: 11, kind: input, shape index: {}]   ;;  %s5135_s12 = inlined_call_operand.vmem [shape: f32[2,1,128], index: 12, kind: input, shape index: {}]   ;;  %s5136_s13 = inlined_call_operand.vmem [shape: f32[1,128], index: 13, kind: input, shape index: {}]   ;;  %s5137_s14 = inlined_call_operand.vmem [shape: f32[1,128], index: 14, kind: input, shape index: {}]   ;;  %s5138_s15 = inlined_call_operand.hbm [shape: f32[2,24,128], index: 15, kind: output, shape index: {}]  }
   0x1   :  { %5184 = sst [smem:[#allocation52_spill]] %s5123_s0 }
   0x2   :  { %5185 = sst [smem:[#allocation53_spill]] %s5124_s1 }
   0x3   :  { %5186 = sst [smem:[#allocation54_spill]] %s5125_s2 }
   0x4   :  { %5187 = sst [smem:[#allocation55_spill]] %s5126_s3 }
   0x5   :  { %5188 = sst [smem:[#allocation56_spill]] %s5127_s4 }
   0x6   :  { %5189 = sst [smem:[#allocation57_spill]] %s5128_s5 }
   0x7   :  { %5190 = sst [smem:[#allocation58_spill]] %s5129_s6 }
   0x8   :  { %5191 = sst [smem:[#allocation59_spill]] %s5130_s7 }
   0x9   :  { %5192 = sst [smem:[#allocation60_spill]] %s5131_s8 }
   0xa   :  { %5193 = sst [smem:[#allocation61_spill]] %s5132_s9 }
   0xb   :  { %5194 = sst [smem:[#allocation62_spill]] %s5133_s10 }
   0xc   :  { %5195 = sst [smem:[#allocation63_spill]] %s5134_s11 }
   0xd   :  { %5196 = sst [smem:[#allocation64_spill]] %s5135_s12 }
   0xe   :  { %5197 = sst [smem:[#allocation65_spill]] %s5136_s13 }
   0xf   :  { %5198 = sst [smem:[#allocation66_spill]] %s5137_s14 }
  0x10   :  { %5199 = sst [smem:[#allocation67_spill]] %s5138_s15 }
  0x11   :  { %20 = vsyncpa [#allocation5], 0 }
  0x12   :  { %22 = vsyncpa [#allocation5 + $0x1], 0 }
  0x13   :  { %23 = vsyncpa [#allocation8], 0 }
  0x14   :  { %25 = vsyncpa [#allocation8 + $0x1], 0 }
  0x15   :  { %26 = vsyncpa [#allocation11], 0 }
  0x16   :  { %28 = vsyncpa [#allocation11 + $0x1], 0 }
  0x17   :  { %29 = vsyncpa [#allocation14], 0 }
  0x18   :  { %31 = vsyncpa [#allocation14 + $0x1], 0 }
  0x19   :  { %32 = vsyncpa [#allocation17], 0 }
  0x1a   :  { %34 = vsyncpa [#allocation17 + $0x1], 0 }
  0x1b   :  { %35 = vsyncpa [#allocation6], 0 }
  0x1c   :  { %37 = vsyncpa [#allocation6 + $0x1], 0  ;;  %s4288_s18 = smov 0   ;;  %s4290_s19 = smov 0  }
  0x1d   :  { %s4292_s20 = smov 0   ;;  %s4294_s21 = smov 0  }
  0x1e   :  { %s4296_s22 = smov 0   ;;  %s4298_s23 = smov 0  }
  0x1f   :  { %s4300_s24 = smov 0   ;;  %s4302_s25 = smov 0  }
  0x20   :  { %s4304_s26 = smov 0   ;;  %s4306_s27 = smov 0  }
  0x21   :  { %s4308_s28 = smov 0   ;;  %s4310_s29 = smov 0  }
  0x22   :  { %s4312_s30 = smov 0   ;;  %s4314_s16 = smov 0  }
  0x23   :  { %s4316_s17 = smov 0   ;;  %s4318_s15 = smov 0  }
  0x24 LB: > { %5200 = sst [smem:[#allocation26_spill]] %s4126_s19  ;;  %p77_p0 = scmp.eq.s32.totalorder %s4182_s15, 0  ;;  %s4182_s15 = sphi %s4318_s15, %s43_s15   ;;  %s4178_s17 = sphi %s4316_s17, %s5318_s17   ;;  %s4174_s16 = sphi %s4314_s16, %s5317_s16   ;;  %s4170_s30 = sphi %s4312_s30, %s5316_s30   ;;  %s4166_s29 = sphi %s4310_s29, %s5315_s29   ;;  %s4162_s28 = sphi %s4308_s28, %s5314_s28   ;;  %s4158_s27 = sphi %s4306_s27, %s5313_s27   ;;  %s4154_s26 = sphi %s4304_s26, %s5312_s26   ;;  %s4150_s25 = sphi %s4302_s25, %s5311_s25   ;;  %s4146_s24 = sphi %s4300_s24, %s5310_s24   ;;  %s4142_s23 = sphi %s4298_s23, %s5309_s23   ;;  %s4138_s22 = sphi %s4296_s22, %s5308_s22   ;;  %s4134_s21 = sphi %s4294_s21, %s5307_s21   ;;  %s4130_s20 = sphi %s4292_s20, %s5306_s20   ;;  %s4126_s19 = sphi %s4290_s19, %s5305_s19   ;;  %s4122_s18 = sphi %s4288_s18, %s5304_s18  }
  0x25   : > { %5201 = sst [smem:[#allocation27_spill]] %s4130_s20  ;;  %p102_p1 = scmp.ne.s32.totalorder %s4142_s23, %s4138_s22 }
  0x26   : > { %5202 = sst [smem:[#allocation28_spill]] %s4134_s21  ;;  %p5158_p3 = scmp.lt.s32.totalorder %s4182_s15, 8 }
  0x27   : > { %5203 = sst [smem:[#allocation29_spill]] %s4138_s22  ;;  %p104_p4 = por %p102_p1, %p77_p0 }
  0x28   : > { %5204 = sst [smem:[#allocation30_spill]] %s4142_s23  ;;  %s4381_s13 = sand.u32 1, %s4142_s23  }
  0x29   : > { %5205 = sst [smem:[#allocation31_spill]] %s4146_s24  ;;  %s4384_s10 = sshll.u32 %s4174_s16, 4 }
  0x2a   : > { %5206 = sst [smem:[#allocation32_spill]] %s4150_s25  ;;  %p4393_p5 = pnand %p5158_p3, %p104_p4 }
  0x2b   : > { %5207 = sst [smem:[#allocation33_spill]] %s4154_s26  ;;  %p3046_p6 = scmp.ge.s32.totalorder %s4182_s15, 1 }
  0x2c   : > { %5208 = sst [smem:[#allocation34_spill]] %s4158_s27  ;;  %s522_s27 = scalar_lea.vmem [#allocation7], %s4381_s13 }
  0x2d   : > { %5209 = sst [smem:[#allocation35_spill]] %s4162_s28  ;;  %s529_s14 = sshll.u32 %s522_s27, 4  ;;  %s530_s14 = int_to_ptr.vmem [resolvable:$true] %s529_s14 }
  0x2e   : > { %5210 = sst [smem:[#allocation36_spill]] %s4166_s29  ;;  %s4378_s29 = sand.u32 1, %s4182_s15  }
  0x2f   : > { %5211 = sst [smem:[#allocation37_spill]] %s4170_s30  ;;  %p704_p7 = scmp.lt.s32.totalorder %s4182_s15, 9 }
  0x30   : > { %5212 = sst [smem:[#allocation38_spill]] %s4174_s16  ;;  %s5145_s11 = scalar_lea.sflag [#allocation8], %s4378_s29 }
  0x31   : > { %5213 = sst [smem:[#allocation39_spill]] %s4178_s17  ;;  %p4402_p8 = pneg %p4393_p5 }
  0x32   : > { %5214 = sst [smem:[#allocation40_spill]] %s4182_s15  ;;  %s3767_s4 = scalar_lea.vmem %s530_s14, 16 }
  0x33   : > { %5215 = sst [smem:[#allocation41_spill]] %s4381_s13  ;;  %p3768_p9 = scmp.ne.s32.totalorder %s530_s14, %s3767_s4 }
  0x34   : > { %s5216_s1 = sld [smem:[#allocation53_spill]]  ;;  %s4184_s12 = smov [#allocation7]  }
  0x35   : > { %s5217_s28 = scalar_select %p4393_p5, 1, 0 }
  0x36   : > { %s5219_s8 = scalar_select %p4402_p8, 1, 0 }
  0x37   : > { %5218 = sst [smem:[#allocation42_spill]] %s5217_s28  ;;  %p3770_p10 = pnand %p3768_p9, %p4402_p8 }
  0x38   : > { %5220 = sst [smem:[#allocation43_spill]] %s5219_s8  ;;  %s3772_s27 = sshll.u32 %s4184_s12, 4  ;;  %s3773_s27 = int_to_ptr.vmem [resolvable:$false] %s3772_s27 }
  0x39   : > { %p3771_p11 = pneg %p3770_p10  ;;  %p3775_p12 = scmp.lt.s32.totalorder %s530_s14, %s3773_s27 }
  0x3a   : > { %s527_s6 = scalar_lea.hbm %s5216_s1, %s4384_s10  ;;  %s3774_s1 = scalar_lea.vmem %s3773_s27, 32 }
  0x3b   : > { %p3776_p13 = scmp.lt.s32.totalorder %s3774_s1, %s3767_s4 }
  0x3d   : > { %p3777_p1 = por %p3776_p13, %p3775_p12 }
  0x3f   : > { %p3778_p4 = pnand %p3777_p1, %p3771_p11 }
  0x41   : > { %3781 = shalt.err (!%p3778_p4)
}
  0x42   : > { %3419 = dma.hbm_to_vmem [thread:$0]  (!%p4393_p5), %s527_s6, 16, %s530_s14, %s5145_s11  }
  0x43   : > { %p4416_p9 = pnand %p3046_p6, %p704_p7  ;;  %s3386_s1 = smul.u32 192, %s4381_s13 }
  0x44   : > { %s3387_s4 = smul.u32 3072, %s4174_s16  ;;  %s5223_s3 = sld [smem:[#allocation55_spill]] }
  0x45   : > { %s5221_s12 = scalar_select %p4416_p9, 1, 0 }
  0x46   : > { %s557_s0 = scalar_lea.vmem [#allocation10], %s3386_s1  ;;  %s5149_s22 = scalar_lea.sflag [#allocation11], %s4378_s29 }
  0x47   : > { %5222 = sst [smem:[#allocation44_spill]] %s5221_s12  ;;  %s564_s21 = sshll.u32 %s557_s0, 4  ;;  %s565_s21 = int_to_ptr.vmem [resolvable:$true] %s564_s21 }
  0x48   : > { %s3795_s24 = scalar_lea.vmem %s565_s21, 3072  ;;  %s4185_s6 = smov [#allocation10]  }
  0x49   : > { %p3796_p10 = scmp.ne.s32.totalorder %s565_s21, %s3795_s24  ;;  %s3800_s14 = sshll.u32 %s4185_s6, 4  ;;  %s3801_s14 = int_to_ptr.vmem [resolvable:$false] %s3800_s14 }
  0x4a   : > { %s563_s2 = scalar_lea.hbm %s5223_s3, %s3387_s4  ;;  %s3802_s11 = scalar_lea.vmem %s3801_s14, 6144 }
  0x4b   : > { %p3798_p11 = pnand %p3796_p10, %p4402_p8  ;;  %p3803_p6 = scmp.lt.s32.totalorder %s565_s21, %s3801_s14 }
  0x4c   : > { %p3804_p7 = scmp.lt.s32.totalorder %s3802_s11, %s3795_s24 }
  0x4d   : > { %p3799_p12 = pneg %p3798_p11 }
  0x4e   : > { %p3805_p13 = por %p3804_p7, %p3803_p6 }
  0x50   : > { %p3806_p1 = pnand %p3805_p13, %p3799_p12 }
  0x52   : > { %3809 = shalt.err (!%p3806_p1)
}
  0x53   : > { %s4186_s5 = smov 192   ;;  %s4187_s0 = smov 12  }
  0x54   : > { %3425 = dma.hbm_to_vmem [thread:$0]  (!%p4393_p5), %s563_s2, 3072, %s565_s21, %s5149_s22, %s4186_s5, %s4186_s5, %s4187_s0  }
  0x55   : > { %s5224_s7 = sld [smem:[#allocation59_spill]]  ;;  %s611_s6 = scalar_lea.vmem [#allocation13], %s4381_s13 }
  0x56   : > { %s618_s11 = sshll.u32 %s611_s6, 4  ;;  %s5148_s24 = scalar_lea.sflag [#allocation14], %s4378_s29  ;;  %s619_s11 = int_to_ptr.vmem [resolvable:$true] %s618_s11 }
  0x57   : > { %s3823_s14 = scalar_lea.vmem %s619_s11, 16  ;;  %s4188_s3 = smov [#allocation13]  }
  0x58   : > { %p3824_p4 = scmp.ne.s32.totalorder %s619_s11, %s3823_s14  ;;  %s3828_s12 = sshll.u32 %s4188_s3, 4  ;;  %s3829_s12 = int_to_ptr.vmem [resolvable:$false] %s3828_s12 }
  0x59   : > { %s3830_s25 = scalar_lea.vmem %s3829_s12, 32  ;;  %p3831_p12 = scmp.lt.s32.totalorder %s619_s11, %s3829_s12 }
  0x5a   : > { %p3826_p10 = pnand %p3824_p4, %p4402_p8  ;;  %p3832_p6 = scmp.lt.s32.totalorder %s3830_s25, %s3823_s14 }
  0x5b   : > { %s616_s27 = scalar_lea.hbm %s5224_s7, %s4384_s10 }
  0x5c   : > { %p3827_p11 = pneg %p3826_p10  ;;  %p3833_p7 = por %p3832_p6, %p3831_p12 }
  0x5e   : > { %p3834_p13 = pnand %p3833_p7, %p3827_p11 }
  0x60   : > { %3837 = shalt.err (!%p3834_p13)
}
  0x61   : > { %3431 = dma.hbm_to_vmem [thread:$0]  (!%p4393_p5), %s616_s27, 16, %s619_s11, %s5148_s24  }
  0x62   : > { %s55_s2 = sadd.s32 1, %s4170_s30  ;;  %s58_s3 = sadd.s32 1, %s4174_s16 }
  0x63   : > { %p56_p1 = scmp.ge.s32.totalorder %s55_s2, 2  ;;  %s305_s21 = sadd.s32 1, %s4130_s20 }
  0x64   : > { %p312_p4 = scmp.ne.s32.totalorder %s4130_s20, %s4126_s19  ;;  %s644_s5 = sand.u32 1, %s4130_s20  }
  0x65   : > { %s5320_s2 = smov (%p56_p1, %s55_s2), 0  ;;  %s5322_s3 = smov (!%p56_p1, %s58_s3), %s4174_s16 }
  0x66   : > { %5225 = sst [smem:[#allocation45_spill]] %s5320_s2  ;;  %s301_s25 = ssub.s32 %s4170_s30, %s5320_s2 }
  0x67   : > { %p4458_p10 = por %p312_p4, %p77_p0  ;;  %p60_p11 = scmp.ge.s32.totalorder %s5322_s3, 2 }
  0x68   : > { %s3039_s0 = sshll.u32 %s4170_s30, 1  ;;  %s4472_s4 = sshll.u32 %s644_s5, 7 }
  0x69   : > { %s4470_s1 = scalar_select %p60_p11, 0, %s5322_s3  }
  0x6a   : > { %s5159_s27 = sshll.u32 %s4174_s16, 6  ;;  %s5228_s24 = sadd.s32 1, %s4142_s23 }
  0x6b   : > { %5227 = sst [smem:[#allocation46_spill]] %s4470_s1  ;;  %s92_s6 = ssub.s32 %s4174_s16, %s4470_s1 }
  0x6c   : > { %p93_p6 = scmp.eq.s32.totalorder %s92_s6, 0  ;;  %s302_s11 = sor.u32 %s301_s25, %s92_s6 }
  0x6d   : > { %p303_p7 = scmp.eq.s32.totalorder %s302_s11, 0  ;;  %s652_s14 = sadd.s32 %s5159_s27, %s3039_s0 }
  0x6e   : > { %s4482_s22 = scalar_select %p93_p6, %s4142_s23, %s5228_s24  }
  0x6f   : > { %s4485_s7 = scalar_select %p303_p7, %s4130_s20, %s305_s21  }
  0x70   : > { %5229 = sst [smem:[#allocation47_spill]] %s4482_s22  ;;  %s3041_s2 = sshll.u32 %s652_s14, 6 }
  0x71   : > { %5230 = sst [smem:[#allocation48_spill]] %s4485_s7  ;;  %s646_s30 = scalar_lea.vmem [#allocation16], %s4472_s4 }
  0x72   : > { %s655_s28 = sshll.u32 %s646_s30, 4  ;;  %s5231_s9 = sld [smem:[#allocation61_spill]]  ;;  %s656_s28 = int_to_ptr.vmem [resolvable:$true] %s655_s28 }
  0x73   : > { %p4495_p13 = pnand %p5158_p3, %p4458_p10  ;;  %s5162_s24 = scalar_lea.sflag [#allocation17], %s4378_s29 }
  0x74   : > { %s3851_s21 = scalar_lea.vmem %s656_s28, 2048  ;;  %s4189_s8 = smov [#allocation16]  }
  0x75   : > { %s5232_s25 = scalar_select %p4495_p13, 1, 0 }
  0x76   : > { %p5160_p1 = pneg %p4495_p13  ;;  %p3852_p4 = scmp.ne.s32.totalorder %s656_s28, %s3851_s21 }
  0x77   : > { %s3856_s13 = sshll.u32 %s4189_s8, 4  ;;  %s3857_s13 = int_to_ptr.vmem [resolvable:$false] %s3856_s13 }
  0x78   : > { %s654_s5 = scalar_lea.hbm %s5231_s9, %s3041_s2  ;;  %p3854_p6 = pnand %p3852_p4, %p5160_p1 }
  0x79   : > { %s3858_s30 = scalar_lea.vmem %s3857_s13, 4096  ;;  %p3859_p12 = scmp.lt.s32.totalorder %s656_s28, %s3857_s13 }
  0x7a   : > { %p3855_p7 = pneg %p3854_p6  ;;  %p3860_p10 = scmp.lt.s32.totalorder %s3858_s30, %s3851_s21 }
  0x7c   : > { %p3861_p3 = por %p3860_p10, %p3859_p12 }
  0x7e   : > { %p3862_p2 = pnand %p3861_p3, %p3855_p7 }
  0x80   : > { %3865 = shalt.err (!%p3862_p2)
}
  0x81   : > { %s4190_s2 = smov 256   ;;  %s5233_s12 = sld [smem:[#allocation32_spill]] }
  0x82   : > { %s5234_s0 = sld [smem:[#allocation31_spill]]  ;;  %s4191_s14 = smov 128  }
  0x83   : > { %s5235_s6 = sld [smem:[#allocation29_spill]]  ;;  %s4192_s21 = smov 8  }
  0x84   : > { %s5236_s11 = sld [smem:[#allocation28_spill]]  ;;  %s4510_s8 = sadd.s32 4294967295, %s4182_s15  }
  0x85   : > { %3437 = dma.hbm_to_vmem [thread:$0]  (!%p4495_p13), %s654_s5, 2048, %s656_s28, %s5162_s24, %s4190_s2, %s4191_s14, %s4192_s21  }
  0x86   : > { %s3026_s13 = sadd.s32 4294967294, %s4182_s15   ;;  %s62_s30 = sadd.s32 1, %s4178_s17 }
  0x87   : > { %s5324_s30 = smov (!%p60_p11, %s62_s30), %s4178_s17  ;;  %s69_s27 = sadd.s32 1, %s4154_s26 }
  0x88   : > { %p5161_p2 = scmp.ne.s32.totalorder %s4154_s26, %s5233_s12  ;;  %p64_p3 = scmp.ge.s32.totalorder %s5324_s30, 2 }
  0x89   : > { %p5163_p12 = scmp.ne.s32.totalorder %s5233_s12, %s5234_s0  ;;  %p83_p6 = scmp.eq.s32.totalorder %s4510_s8, 0 }
  0x8a   : > { %p4527_p4 = por %p77_p0, %p5161_p2  ;;  %s5326_s30 = smov (%p64_p3, %s5324_s30), 0 }
  0x8b   : > { %5238 = sst [smem:[#allocation49_spill]] %s5326_s30  ;;  %p4537_p11 = por %p83_p6, %p5163_p12 }
  0x8c   : > { %p5240_p7 = scmp.ne.s32.totalorder %s5235_s6, %s5236_s11  ;;  %s66_s2 = ssub.s32 %s4178_s17, %s5326_s30 }
  0x8d   : > { %s5239_s3 = scalar_select %p4537_p11, 1, 0 }
  0x8e   : > { %p4544_p10 = por %p5240_p7, %p83_p6  ;;  %p5242_p0 = scmp.ne.s32.totalorder %s4126_s19, %s4122_s18 }
  0x8f   : > { %p67_p2 = scmp.eq.s32.totalorder %s66_s2, 0  ;;  %p466_p3 = scmp.eq.s32.totalorder %s4510_s8, 7 }
  0x90   : > { %p4553_p1 = por %p5242_p0, %p83_p6  ;;  %p472_p9 = scmp.eq.s32.totalorder %s3026_s13, 7 }
  0x91   : > { %s498_s21 = sand.u32 1, %s4154_s26   ;;  %p5245_p12 = scmp.ne.s32.totalorder %s4154_s26, %s5233_s12 }
  0x92   : > { %s4560_s24 = scalar_select %p67_p2, %s4154_s26, %s69_s27  }
  0x93   : > { %p4565_p13 = por %p466_p3, %p5245_p12  ;;  %p5248_p7 = scmp.ne.s32.totalorder %s5233_s12, %s5234_s0 }
  0x94   : > { %5244 = sst [smem:[#allocation50_spill]] %s4560_s24  ;;  %s3384_s18 = smul.u32 12, %s498_s21 }
  0x95   : > { %s5246_s9 = scalar_select %p4565_p13, 1, 0 }
  0x96   : > { %p4572_p11 = por %p472_p9, %p5248_p7  ;;  %s3385_s11 = smul.u32 192, %s4178_s17 }
  0x97   : > { %5247 = sst [smem:[#allocation28_spill]] %s5246_s9  ;;  %p5251_p6 = scmp.lt.s32.totalorder %s4182_s15, 8 }
  0x98   : > { %s5249_s6 = scalar_select %p4572_p11, 1, 0 }
  0x99   : > { %p4581_p0 = pnand %p5251_p6, %p4527_p4  ;;  %s5253_s30 = sld [smem:[#allocation52_spill]] }
  0x9a   : > { %5250 = sst [smem:[#allocation51_spill]] %s5249_s6  ;;  %s502_s24 = scalar_lea.vmem [#allocation4], %s3384_s18 }
  0x9b   : > { %s509_s26 = sshll.u32 %s502_s24, 4  ;;  %s499_s12 = scalar_lea.sflag [#allocation5], %s498_s21  ;;  %s510_s26 = int_to_ptr.vmem [resolvable:$true] %s509_s26 }
  0x9c   : > { %p3868_p9 = pneg %p4581_p0  ;;  %s3879_s0 = scalar_lea.vmem %s510_s26, 192 }
  0x9d   : > { %p3880_p2 = scmp.ne.s32.totalorder %s510_s26, %s3879_s0  ;;  %s4193_s28 = smov [#allocation4]  }
  0x9e   : > { %s3884_s17 = sshll.u32 %s4193_s28, 4  ;;  %s3885_s17 = int_to_ptr.vmem [resolvable:$false] %s3884_s17 }
  0x9f   : > { %s508_s1 = scalar_lea.hbm %s5253_s30, %s3385_s11  ;;  %p3882_p12 = pnand %p3880_p2, %p3868_p9 }
  0xa0   : > { %s3886_s22 = scalar_lea.vmem %s3885_s17, 384  ;;  %p3887_p4 = scmp.lt.s32.totalorder %s510_s26, %s3885_s17 }
  0xa1   : > { %p3883_p3 = pneg %p3882_p12  ;;  %p3888_p7 = scmp.lt.s32.totalorder %s3886_s22, %s3879_s0 }
  0xa3   : > { %p3889_p6 = por %p3888_p7, %p3887_p4 }
  0xa5   : > { %p3890_p11 = pnand %p3889_p6, %p3883_p3 }
  0xa7   : > { %3893 = shalt.err (!%p3890_p11)
}
  0xa8   : > { %s5173_s30 = smov 64   ;;  %s5254_s24 = sld [smem:[#allocation41_spill]] }
  0xa9   : > { %s5175_s18 = smov 4   ;;  %s5256_s13 = sld [smem:[#allocation54_spill]] }
  0xaa   : > { %3416 = dma.hbm_to_vmem [thread:$0]  (!%p4581_p0), %s508_s1, 192, %s510_s26, %s499_s12, %s5173_s30, %s5173_s30, %s5175_s18  }
  0xab   : > { %s4196_s7 = smov [#allocation9]  }
  0xac   : > { %s3912_s20 = sshll.u32 %s4196_s7, 4  ;;  %s3913_s20 = int_to_ptr.vmem [resolvable:$false] %s3912_s20 }
  0xad   : > { %s3914_s2 = scalar_lea.vmem %s3913_s20, 32 }
  0xae   : > { %s539_s22 = scalar_lea.vmem [#allocation9], %s5254_s24  ;;  %s3033_s28 = sshll.u32 %s5254_s24, 6 }
  0xaf   : > { %s544_s17 = scalar_lea.hbm %s5256_s13, %s4384_s10  ;;  %s546_s0 = sshll.u32 %s539_s22, 4  ;;  %s547_s0 = int_to_ptr.vmem [resolvable:$true] %s546_s0 }
  0xb0   : > { %s3907_s23 = scalar_lea.vmem %s547_s0, 16  ;;  %p3915_p12 = scmp.lt.s32.totalorder %s547_s0, %s3913_s20 }
  0xb1   : > { %p3908_p11 = scmp.ne.s32.totalorder %s547_s0, %s3907_s23  ;;  %p3916_p3 = scmp.lt.s32.totalorder %s3914_s2, %s3907_s23 }
  0xb3   : > { %p3910_p9 = pnand %p3908_p11, %p4402_p8  ;;  %p3917_p0 = por %p3916_p3, %p3915_p12 }
  0xb5   : > { %p3911_p2 = pneg %p3910_p9 }
  0xb7   : > { %p3918_p4 = pnand %p3917_p0, %p3911_p2 }
  0xb9   : > { %3921 = shalt.err (!%p3918_p4)
}
  0xba   : > { %s5258_s1 = scalar_lea.sflag [#allocation8], %s4378_s29  ;;  %s3163_s12 = sshll.u32 %s4174_s16, 10 }
  0xbb   : > { %3422 = dma.hbm_to_vmem [thread:$0]  (!%p4393_p5), %s544_s17, 16, %s547_s0, %s5258_s1  }
  0xbc   : > { %s5259_s13 = sld [smem:[#allocation57_spill]]  ;;  %s585_s7 = scalar_lea.vmem [#allocation12], %s3033_s28 }
  0xbd   : > { %s592_s30 = sshll.u32 %s585_s7, 4  ;;  %s4197_s23 = smov [#allocation12]   ;;  %s593_s30 = int_to_ptr.vmem [resolvable:$true] %s592_s30 }
  0xbe   : > { %s3935_s20 = scalar_lea.vmem %s593_s30, 1024  ;;  %s3940_s2 = sshll.u32 %s4197_s23, 4  ;;  %s3941_s2 = int_to_ptr.vmem [resolvable:$false] %s3940_s2 }
  0xbf   : > { %p3936_p7 = scmp.ne.s32.totalorder %s593_s30, %s3935_s20  ;;  %s3942_s18 = scalar_lea.vmem %s3941_s2, 2048 }
  0xc0   : > { %p3943_p9 = scmp.lt.s32.totalorder %s593_s30, %s3941_s2  ;;  %p3944_p2 = scmp.lt.s32.totalorder %s3942_s18, %s3935_s20 }
  0xc1   : > { %p3938_p6 = pnand %p3936_p7, %p4402_p8 }
  0xc2   : > { %s591_s22 = scalar_lea.hbm %s5259_s13, %s3163_s12  ;;  %p3945_p12 = por %p3944_p2, %p3943_p9 }
  0xc3   : > { %p3939_p11 = pneg %p3938_p6 }
  0xc5   : > { %p3946_p3 = pnand %p3945_p12, %p3939_p11 }
  0xc7   : > { %3949 = shalt.err (!%p3946_p3)
}
  0xc8   : > { %s5260_s17 = smov 4   ;;  %s5261_s0 = smov 64  }
  0xc9   : > { %s5262_s28 = scalar_lea.sflag [#allocation11], %s4378_s29  ;;  %s5263_s11 = sld [smem:[#allocation60_spill]] }
  0xca   : > { %3428 = dma.hbm_to_vmem [thread:$0]  (!%p4393_p5), %s591_s22, 1024, %s593_s30, %s5262_s28, %s5261_s0, %s5261_s0, %s5260_s17  }
  0xcb   : > { %s628_s13 = scalar_lea.vmem [#allocation15], %s5254_s24  ;;  %s4198_s20 = smov [#allocation15]  }
  0xcc   : > { %s635_s18 = sshll.u32 %s628_s13, 4  ;;  %s3968_s23 = sshll.u32 %s4198_s20, 4  ;;  %s636_s18 = int_to_ptr.vmem [resolvable:$true] %s635_s18  ;;  %s3969_s23 = int_to_ptr.vmem [resolvable:$false] %s3968_s23 }
  0xcd   : > { %s3963_s7 = scalar_lea.vmem %s636_s18, 16  ;;  %s3970_s2 = scalar_lea.vmem %s3969_s23, 32 }
  0xce   : > { %p3964_p0 = scmp.ne.s32.totalorder %s636_s18, %s3963_s7  ;;  %p3971_p6 = scmp.lt.s32.totalorder %s636_s18, %s3969_s23 }
  0xcf   : > { %s633_s27 = scalar_lea.hbm %s5263_s11, %s4384_s10  ;;  %p3972_p11 = scmp.lt.s32.totalorder %s3970_s2, %s3963_s7 }
  0xd0   : > { %p3966_p4 = pnand %p3964_p0, %p4402_p8 }
  0xd1   : > { %p3973_p9 = por %p3972_p11, %p3971_p6 }
  0xd2   : > { %p3967_p7 = pneg %p3966_p4 }
  0xd4   : > { %p3974_p2 = pnand %p3973_p9, %p3967_p7 }
  0xd6   : > { %3977 = shalt.err (!%p3974_p2)
}
  0xd7   : > { %s5264_s10 = scalar_lea.sflag [#allocation14], %s4378_s29  ;;  %s5265_s30 = sld [smem:[#allocation37_spill]] }
  0xd8   : > { %3434 = dma.hbm_to_vmem [thread:$0]  (!%p4393_p5), %s633_s27, 16, %s636_s18, %s5264_s10  }
  0xd9   : > { %s681_s21 = scalar_lea.vmem [#allocation18], %s4472_s4  ;;  %s5266_s28 = sshll.u32 %s4174_s16, 6 }
  0xda   : > { %s690_s22 = sshll.u32 %s681_s21, 4  ;;  %s5267_s7 = sld [smem:[#allocation63_spill]]  ;;  %s691_s22 = int_to_ptr.vmem [resolvable:$true] %s690_s22 }
  0xdb   : > { %s3991_s23 = scalar_lea.vmem %s691_s22, 2048  ;;  %p5268_p12 = scmp.ne.s32.totalorder %s5232_s25, 0 }
  0xdc   : > { %p3992_p8 = scmp.ne.s32.totalorder %s691_s22, %s3991_s23  ;;  %s4199_s26 = smov [#allocation18]  }
  0xdd   : > { %s3043_s24 = sshll.u32 %s5265_s30, 5  ;;  %p5269_p3 = pneg %p5268_p12 }
  0xde   : > { %s687_s1 = sadd.s32 %s3043_s24, %s5266_s28  ;;  %s3996_s2 = sshll.u32 %s4199_s26, 4  ;;  %s3997_s2 = int_to_ptr.vmem [resolvable:$false] %s3996_s2 }
  0xdf   : > { %s3045_s12 = sshll.u32 %s687_s1, 6  ;;  %p3994_p0 = pnand %p3992_p8, %p5269_p3 }
  0xe0   : > { %s689_s20 = scalar_lea.hbm %s5267_s7, %s3045_s12  ;;  %s3998_s27 = scalar_lea.vmem %s3997_s2, 4096 }
  0xe1   : > { %p3995_p4 = pneg %p3994_p0  ;;  %p3999_p5 = scmp.lt.s32.totalorder %s691_s22, %s3997_s2 }
  0xe2   : > { %p4000_p7 = scmp.lt.s32.totalorder %s3998_s27, %s3991_s23 }
  0xe4   : > { %p4001_p6 = por %p4000_p7, %p3999_p5 }
  0xe6   : > { %p4002_p11 = pnand %p4001_p6, %p3995_p4 }
  0xe8   : > { %4005 = shalt.err (!%p4002_p11)
}
  0xe9   : > { %s5270_s4 = scalar_lea.sflag [#allocation17], %s4378_s29  ;;  %s5271_s18 = sld [smem:[#allocation44_spill]] }
  0xea   : > { %3440 = dma.hbm_to_vmem [thread:$0]  (!%p5268_p12), %s689_s20, 2048, %s691_s22, %s5270_s4, %s5261_s0, %s5261_s0, %s5260_s17  }
  0xef   : > { %p5272_p9 = scmp.ne.s32.totalorder %s5271_s18, 0 }
  0xf0   : > { %s5273_s10 = sld [smem:[#allocation32_spill]] (!%p5272_p9)  ;;  %p5274_p2 = scmp.ne.s32.totalorder (!%p5272_p9), %s5239_s3, 0 }
  0xf1   : > { %708 = sbr.rel (%p5272_p9) target bundleno = 4099 (0x1003), region = 80 }
  0xf6   : > { %s4651_s30 = sand.u32 1, %s5273_s10  }
  0xf7   : > { %s3388_s24 = smul.u32 12, %s4651_s30  ;;  %s711_s21 = scalar_lea.sflag [#allocation5], %s4651_s30 }
  0xf9   : > { %s4655_s28 = scalar_lea.vmem [#allocation4], %s3388_s24 }
  0xfa   : > { %4097 = dma.done.wait (%p5274_p2), %s711_s21, 192  }
  0xfb   : > { %4099 = vsyncadd (%p5274_p2), %s711_s21, 4294967104  ;;  %s5275_s29 = sld [smem:[#allocation29_spill]]  ;;  %s719_s25 = sand.u32 1, %s4510_s8  }
  0xfc   : > { %s720_s0 = scalar_lea.sflag [#allocation8], %s719_s25 }
 0x101   : > { %s4663_s17 = sand.u32 1, %s5275_s29  }
 0x102   : > { %4101 = dma.done.wait (%p4544_p10), %s720_s0, 32  }
 0x103   : > { %4103 = vsyncadd (%p4544_p10), %s720_s0, 4294967264  ;;  %s3389_s1 = smul.u32 192, %s4663_s17  ;;  %s736_s12 = scalar_lea.sflag [#allocation11], %s719_s25 }
 0x105   : > { %s4672_s11 = scalar_lea.vmem [#allocation10], %s3389_s1 }
 0x106   : > { %4105 = dma.done.wait (%p4544_p10), %s736_s12, 4096  }
 0x107   : > { %4107 = vsyncadd (%p4544_p10), %s736_s12, 4294963200  ;;  %s3047_s8 = sshll.u32 %s4663_s17, 6  ;;  %s754_s7 = scalar_lea.sflag [#allocation14], %s719_s25 }
 0x108   : > { %s4679_s13 = scalar_lea.vmem [#allocation12], %s3047_s8 }
 0x109   : > { %4109 = dma.done.wait (%p4544_p10), %s754_s7, 32  }
 0x10a   : > { %4111 = vsyncadd (%p4544_p10), %s754_s7, 4294967264  ;;  %s771_s23 = sand.u32 1, %s4126_s19   ;;  %s770_s27 = scalar_lea.sflag [#allocation17], %s719_s25 }
 0x10b   : > { %s3048_s26 = sshll.u32 %s771_s23, 7 }
 0x10c   : > { %s4688_s4 = scalar_lea.vmem [#allocation16], %s3048_s26 }
 0x10d   : > { %4113 = dma.done.wait (%p4553_p1), %s770_s27, 4096  }
 0x10e   : > { %4115 = vsyncadd (%p4553_p1), %s770_s27, 4294963200  ;;  %s5276_s18 = sld [smem:[#allocation35_spill]]  ;;  %s3390_s5 = smul.u32 24, %s4651_s30 }
 0x10f   : > { %s5277_s10 = sld [smem:[#allocation34_spill]]  ;;  %s4723_s14 = scalar_lea.vmem [#allocation18], %s3048_s26 }
 0x110   : > { %s5278_s0 = sld [smem:[#allocation58_spill]]  ;;  %s4725_s25 = scalar_lea.vmem [#allocation19], %s3390_s5 }
 0x111   : > { %s5279_s23 = sld [smem:[#allocation64_spill]] }
 0x112   : > { %s5280_s3 = sld [smem:[#allocation56_spill]] }
 0x113   : > { %s5281_s15 = sld [smem:[#allocation62_spill]] }
 0x114   : > { %p883_p10 = scmp.lt.s32.totalorder %s5276_s18, 1  ;;  %p905_p1 = scmp.eq.s32.totalorder %s5276_s18, 0 }
 0x115   : > { %s3050_s24 = sshll.u32 %s5277_s10, 1  ;;  %p906_p12 = scmp.eq.s32.totalorder %s5277_s10, 0 }
 0x116   : > { %p894_p8 = scmp.lt.s32.totalorder %s3050_s24, 3 }
 0x117   : > { %s4698_s21 = scalar_select %p883_p10, %s5276_s18, 1 }
 0x118   : > { %s5328_s24 = smov (!%p894_p8, %s3050_s24), 3  ;;  %p907_p3 = pnand %p906_p12, %p905_p1 }
 0x119   : > { %s3391_s29 = smul.u32 3, %s4698_s21  ;;  %s889_s1 = scalar_lea.vmem %s5278_s0, %s4698_s21 }
 0x11a   : > { %s3051_s12 = sshll.u32 %s4698_s21, 2  ;;  %s903_s27 = scalar_lea.vmem %s5279_s23, %s4698_s21 }
 0x11b   : > { %s4713_s22 = scalar_lea.vmem %s5280_s3, %s3391_s29  ;;  %s4715_s16 = sadd.s32 %s3051_s12, %s5328_s24 }
 0x11c   : > { %s898_s9 = scalar_lea.vmem %s5281_s15, %s4715_s16  ;;  %910 = sbr.rel (%p907_p3) target bundleno = 294 (0x126), region = 120 }
 0x121   : > { %v3180_v0 = vld [vmem:[%s4655_s28] sm:$0xff]   ;;  %v913_v1 = vld [vmem:[%s4655_s28 + $0x8] sm:$0xf] }
 0x122   : > { %v3181_v2 = vunpack.c.l.bf16 %v3180_v0  ;;  %v3182_v3 = vunpack.c.h.bf16 %v3180_v0  ;;  %v916_v4 = vunpack.c.l.bf16 %v913_v1 }
 0x124   : > { %917 = vst [vmem:[%s4725_s25] sm:$0xff] %v3181_v2  ;;  %918 = vst [vmem:[%s4725_s25 + $0x8] sm:$0xff] %v3182_v3 }
 0x125   : > { %919 = vst [vmem:[%s4725_s25 + $0x10] sm:$0xff] %v916_v4 }
 0x126 PF: > { %s5282_s15 = sld [smem:[#allocation34_spill]] }
 0x12c   : > { %p3052_p0 = scmp.ne.s32.totalorder %s5282_s15, 0 }
 0x12d   : > { %s5283_s19 = scalar_lea.vmem (!%p3052_p0), [#allocation7], %s4663_s17  ;;  %s5284_s6 = scalar_lea.vmem (!%p3052_p0), [#allocation9], %s4663_s17 }
 0x12e   : > { %922 = sbr.rel (%p3052_p0) target bundleno = 3284 (0xcd4), region = 124  ;;  %s4201_s28 = smov (!%p3052_p0), 96  }
 0x12f   : > { %s4203_s3 = smov (!%p3052_p0), 32   ;;  %s5287_s10 = scalar_lea.vmem (!%p3052_p0), [#allocation13], %s4663_s17 }
 0x130   : > { %s5288_s5 = scalar_lea.vmem (!%p3052_p0), [#allocation15], %s4663_s17 }
 0x133   : > { %v923_v5 = vld [vmem:[%s4725_s25] sm:$0xff]  ;;  %v925_v6 = vld [vmem:[%s4725_s25 + $0x10] sm:$0xff]  ;;  %v924_v7 = vld [vmem:[%s4725_s25 + $0x8] sm:$0xff]  ;;  %v4200_v37 = vmov 0   ;;  %vm1370_vm0 = vcmask 1043456   ;;  %vm1267_vm1 = vcmask 261120  }
 0x134   : > { %928 = vadd.xlane.f32.xlu0 %v923_v5  ;;  %932 = vadd.xlane.f32.xlu1 %v925_v6  ;;  %v3589_v8 = vld [vmem:[%s4672_s11 + $0xac] ss:$12 sps:$4 sm:$0xff]   ;;  %v3591_v9 = vld [vmem:[%s4672_s11 + $0xa8] ss:$12 sps:$4 sm:$0xff]   ;;  %v3592_v10 = vld [vmem:[%s4672_s11 + $0xb0] ss:$12 sps:$4 sm:$0xff]  }
 0x135   : > { %1159 = vmatprep.subr.bf16.mxu0 %v3589_v8  ;;  %3268 = vmatprep.subr.bf16.mxu1 %v3592_v10  ;;  %v3593_v23 = vld [vmem:[%s4672_s11 + $0x94] ss:$12 sps:$4 sm:$0xff]   ;;  %v3595_v24 = vld [vmem:[%s4672_s11 + $0x90] ss:$12 sps:$4 sm:$0xff]   ;;  %v3596_v25 = vld [vmem:[%s4672_s11 + $0x98] ss:$12 sps:$4 sm:$0xff]  }
 0x136   : > { %1160 = vmatpush1.bf16.msra.mxu0 %v3591_v9  ;;  %3269 = vmatpush3.bf16.msra.mxu1 %v3592_v10  ;;  %v3597_v26 = vld [vmem:[%s4672_s11 + $0x7c] ss:$12 sps:$4 sm:$0xff]   ;;  %v3599_v27 = vld [vmem:[%s4672_s11 + $0x78] ss:$12 sps:$4 sm:$0xff]   ;;  %v3600_v28 = vld [vmem:[%s4672_s11 + $0x80] ss:$12 sps:$4 sm:$0xff]  }
 0x137   : > { %1161 = vmatprep.subr.bf16.mxu0 %v3593_v23  ;;  %3270 = vmatprep.subr.bf16.mxu1 %v3596_v25  ;;  %v3601_v29 = vld [vmem:[%s4672_s11 + $0x64] ss:$12 sps:$4 sm:$0xff]   ;;  %v3603_v30 = vld [vmem:[%s4672_s11 + $0x60] ss:$12 sps:$4 sm:$0xff]   ;;  %v3604_v31 = vld [vmem:[%s4672_s11 + $0x68] ss:$12 sps:$4 sm:$0xff]  }
 0x138   : > { %930 = vadd.xlane.f32.xlu0 %v924_v7  ;;  %v3605_v32 = vld [vmem:[%s4672_s11 + $0x4c] ss:$12 sps:$4 sm:$0xff]   ;;  %v3608_v33 = vld [vmem:[%s4672_s11 + $0x50] ss:$12 sps:$4 sm:$0xff]   ;;  %v3607_v34 = vld [vmem:[%s4672_s11 + $0x48] ss:$12 sps:$4 sm:$0xff]   ;;  %1191 = vmatprep.mubr.bf16.mxu0 %v4200_v37 }
 0x139   : > { %v3609_v35 = vld [vmem:[%s4672_s11 + $0x34] ss:$12 sps:$4 sm:$0xff]   ;;  %v3612_v36 = vld [vmem:[%s4672_s11 + $0x38] ss:$12 sps:$4 sm:$0xff]   ;;  %v3611_v38 = vld [vmem:[%s4672_s11 + $0x30] ss:$12 sps:$4 sm:$0xff]  }
 0x13a   : > { %1162 = vmatpush1.bf16.msra.mxu0 %v3595_v24  ;;  %3271 = vmatpush3.bf16.msra.mxu1 %v3596_v25  ;;  %v3613_v39 = vld [vmem:[%s4672_s11 + $0x1c] ss:$12 sps:$4 sm:$0xff]   ;;  %v3616_v40 = vld [vmem:[%s4672_s11 + $0x20] ss:$12 sps:$4 sm:$0xff]   ;;  %v3615_v41 = vld [vmem:[%s4672_s11 + $0x18] ss:$12 sps:$4 sm:$0xff]  }
 0x13b   : > { %1163 = vmatprep.subr.bf16.mxu0 %v3597_v26  ;;  %3272 = vmatprep.subr.bf16.mxu1 %v3600_v28  ;;  %v3617_v42 = vld [vmem:[%s4672_s11 + $0x4] ss:$12 sps:$4 sm:$0xff]   ;;  %v3620_v43 = vld [vmem:[%s4672_s11 + $0x8] ss:$12 sps:$4 sm:$0xff]   ;;  %v3619_v44 = vld [vmem:[%s4672_s11] ss:$12 sps:$4 sm:$0xff]  }
 0x13c   : > { %v3053_v56 = vld [vmem:[%s5283_s19] ss:$0 sm:$0xff]  ;;  %vm1328_vm2 = vcmask 195584   ;;  %vm1435_vm3 = vcmask 257024   ;;  %vm1629_vm4 = vcmask 519424   ;;  %vm1817_vm5 = vcmask 781824  }
 0x13d   : > { %v3054_v62 = vld [vmem:[%s5284_s6] ss:$0 sm:$0xff]  ;;  %vm2005_vm6 = vcmask 1044224  }
 0x13e   : > { %1164 = vmatpush1.bf16.msra.mxu0 %v3599_v27  ;;  %3273 = vmatpush3.bf16.msra.mxu1 %v3600_v28  ;;  %v1014_v9 = vld [vmem:[%s4713_s22] sm:$0x7]  ;;  %s4202_s22 = smov 64  }
 0x13f   : > { %1165 = vmatprep.subr.bf16.mxu0 %v3601_v29  ;;  %3274 = vmatprep.subr.bf16.mxu1 %v3604_v31 }
 0x142   : > { %1166 = vmatpush1.bf16.msra.mxu0 %v3603_v30  ;;  %3275 = vmatpush3.bf16.msra.mxu1 %v3604_v31 }
 0x143   : > { %1167 = vmatprep.subr.bf16.mxu0 %v3605_v32  ;;  %3276 = vmatprep.subr.bf16.mxu1 %v3608_v33 }
 0x146   : > { %1168 = vmatpush1.bf16.msra.mxu0 %v3607_v34  ;;  %3277 = vmatpush3.bf16.msra.mxu1 %v3608_v33 }
 0x147   : > { %1169 = vmatprep.subr.bf16.mxu0 %v3609_v35  ;;  %3278 = vmatprep.subr.bf16.mxu1 %v3612_v36 }
 0x14a   : > { %1170 = vmatpush1.bf16.msra.mxu0 %v3611_v38  ;;  %3279 = vmatpush3.bf16.msra.mxu1 %v3612_v36 }
 0x14b   : > { %1171 = vmatprep.subr.bf16.mxu0 %v3613_v39  ;;  %3280 = vmatprep.subr.bf16.mxu1 %v3616_v40 }
 0x14e   : > { %1172 = vmatpush1.bf16.msra.mxu0 %v3615_v41  ;;  %3281 = vmatpush3.bf16.msra.mxu1 %v3616_v40 }
 0x14f   : > { %1173 = vmatprep.subr.bf16.mxu0 %v3617_v42  ;;  %3282 = vmatprep.subr.bf16.mxu1 %v3620_v43 }
 0x152   : > { %1174 = vmatpush1.bf16.msra.mxu0 %v3619_v44  ;;  %3283 = vmatpush3.bf16.msra.mxu1 %v3620_v43 }
 0x1bd   : > { %v929_v11 = vpop.xlane.xlu0 %928  ;;  %v933_v12 = vpop.xlane.xlu1 %932 }
 0x1be   : > { %v935_v13 = vmul.f32 0.0078125, %v929_v11  ;;  %v937_v14 = vmul.f32 0.0078125, %v933_v12 }
 0x1c0   : > { %v4739_v15 = vsub.f32 %v923_v5, %v935_v13  ;;  %v4741_v16 = vsub.f32 %v925_v6, %v937_v14  ;;  %v1016_v6 = vlaneseq }
 0x1c1   : > { %v931_v17 = vpop.xlane.xlu0 %930 }
 0x1c2   : > { %v936_v18 = vmul.f32 0.0078125, %v931_v17  ;;  %v941_v19 = vmul.f32 %v4739_v15, %v4739_v15  ;;  %v943_v21 = vmul.f32 %v4741_v16, %v4741_v16 }
 0x1c4   : > { %v4745_v20 = vsub.f32 %v924_v7, %v936_v18  ;;  %944 = vadd.xlane.f32.xlu1 %v941_v19  ;;  %v1017_v7 = vshrl.u32 %v1016_v6, 7 }
 0x1c6   : > { %v942_v22 = vmul.f32 %v4745_v20, %v4745_v20  ;;  %v1026_v8 = vsub.s32 2, %v1017_v7  ;;  %v1018_v10 = vsub.s32 0, %v1017_v7 }
 0x1c8   : > { %948 = vadd.xlane.f32.xlu1 %v943_v21  ;;  %946 = vadd.xlane.f32.xlu0 %v942_v22  ;;  %v1027_v11 = vrot.slane %v1014_v9, %v1026_v8  ;;  %v1019_v12 = vrot.slane %v1014_v9, %v1018_v10  ;;  %v1022_v21 = vsub.s32 1, %v1017_v7 }
 0x1ca   : > { %v1023_v32 = vrot.slane %v1014_v9, %v1022_v21 }
 0x24d   : > { %v945_v45 = vpop.xlane.xlu1 %944 }
 0x24e   : > { %v950_v46 = vmul.f32 0.0078125, %v945_v45 }
 0x250   : > { %v953_v47 = vadd.f32 1e-06, %v950_v46 }
 0x251   : > { %v949_v48 = vpop.xlane.xlu1 %948  ;;  %v947_v49 = vpop.xlane.xlu0 %946 }
 0x252   : > { %3631 = vrsqrt.f32 %v953_v47  ;;  %v952_v50 = vmul.f32 0.0078125, %v949_v48  ;;  %v951_v51 = vmul.f32 0.0078125, %v947_v49 }
 0x254   : > { %v955_v52 = vadd.f32 1e-06, %v952_v50  ;;  %v954_v53 = vadd.f32 1e-06, %v951_v51 }
 0x256   : > { %3633 = vrsqrt.f32 %v955_v52 }
 0x257   : > { %3635 = vrsqrt.f32 %v954_v53 }
 0x25f   : > { %v3632_v54 = vpop.eup %3631 }
 0x260   : > { %v959_v55 = vmul.f32 %v3632_v54, %v4739_v15 }
 0x262   : > { %v968_v61 = vmul.f32 %v3053_v56, %v959_v55 }
 0x263   : > { %v3634_v57 = vpop.eup %3633 }
 0x264   : > { %v3636_v58 = vpop.eup %3635  ;;  %v961_v59 = vmul.f32 %v3634_v57, %v4741_v16  ;;  %v977_v2 = vadd.f32 %v3054_v62, %v968_v61 }
 0x265   : > { %v960_v60 = vmul.f32 %v3636_v58, %v4745_v20 }
 0x266   : > { %v970_v63 = vmul.f32 %v3053_v56, %v961_v59 }
 0x267   : > { %v969_v0 = vmul.f32 %v3053_v56, %v960_v60 }
 0x268   : > { %v979_v1 = vadd.f32 %v3054_v62, %v970_v63 }
 0x269   : > { %v978_v3 = vadd.f32 %v3054_v62, %v969_v0 }
 0x26a   : > { %v981_v4 = vpack.c.bf16 %v979_v1, %v979_v1 }
 0x26b   : > { %v980_v5 = vpack.c.bf16 %v978_v3, %v977_v2 }
 0x26d   : > { %1192 = vmatmul.mubr.bf16.vlgmr.msra.gmra.mxu0 %v980_v5  ;;  %3284 = vmatprep.mubr.bf16.mxu1 %v980_v5 }
 0x26e   : > { %3285 = vmatmul.mubr.bf16.vlgmr.msra.gmra.mxu1 %v981_v4  ;;  %1201 = vmatprep.mubr.bf16.mxu0 %v4200_v37 }
 0x275   : > { %1202 = vmatmul.mubr.bf16.gmra.mxu0 %v981_v4 }
 0x32d   : > { %v1193_v13 = vpop.f32.mrf.mxu0 }
 0x32e   : > { %v3286_v14 = vpop.f32.mrf.mxu1  ;;  %v1194_v17 = vadd.f32 %v1193_v13, %v1019_v12 }
 0x32f   : > { %v1253_v15 = vadd.f32 %v3286_v14, %v1027_v11  ;;  %v1195_v16 = vpop.f32.mrf.mxu0 }
 0x330   : > { %v1244_v18 = vpop.f32.mrf.mxu1  ;;  %v1258_v26 = vmul.f32 0.17677669, %v1194_v17  ;;  %v1196_v39 = vadd.f32 %v1195_v16, %v1023_v32 }
 0x331   : > { %v4780_v19 = vpack.c.bf16 %v1253_v15, %v1253_v15  ;;  %v1197_v20 = vpop.f32.mrf.mxu0  ;;  %v1245_v29 = vadd.f32 %v1244_v18, %v1027_v11 }
 0x332   : > { %v1198_v22 = vadd.f32 %v1197_v20, %v1019_v12  ;;  %v3287_v23 = vpop.f32.mrf.mxu1 }
 0x333   : > { %v1199_v24 = vpop.f32.mrf.mxu0  ;;  %3374 = vmatprep.subr.msk.bf16.mxu1 %vm1370_vm0, %v4780_v19  ;;  %v1372_v25 = vsel %vm1370_vm0, %v4780_v19, 0 }
 0x334   : > { %v1259_v27 = vmul.f32 0.17677669, %v1198_v22  ;;  %v1247_v28 = vpop.f32.mrf.mxu1  ;;  %3297 = vmatpush3.bf16.msra.mxu1 %v1372_v25  ;;  %v1200_v36 = vadd.f32 %v1199_v24, %v1023_v32 }
 0x335   : > { %v1248_v30 = vadd.f32 %v1247_v28, %v1027_v11  ;;  %v1203_v31 = vpop.f32.mrf.mxu0 }
 0x336   : > { %v4786_v33 = vpack.c.bf16 %v1259_v27, %v1258_v26  ;;  %v4796_v42 = vpack.c.bf16 %v1200_v36, %v1196_v39  ;;  %v1204_v44 = vadd.f32 %v1203_v31, %v1019_v12 }
 0x337   : > { %v4788_v34 = vpack.c.bf16 %v1248_v30, %v1245_v29  ;;  %v1205_v35 = vpop.f32.mrf.mxu0 }
 0x338   : > { %v1206_v37 = vadd.f32 %v1205_v35, %v1023_v32  ;;  %3292 = vmatprep.mubr.msk.bf16.mxu0 %vm1267_vm1, %v4786_v33  ;;  %v1275_v45 = vsel %vm1267_vm1, %v4796_v42, 0  ;;  %v1260_v46 = vmul.f32 0.17677669, %v1204_v44 }
 0x339   : > { %v1207_v38 = vpop.f32.mrf.mxu0  ;;  %3298 = vmatprep.subr.bf16.mxu1 %v4788_v34 }
 0x33a   : > { %v4793_v40 = vpack.c.bf16 %v1206_v37, %v1206_v37  ;;  %3299 = vmatpush3.bf16.msra.mxu1 %v4788_v34  ;;  %v4806_v47 = vpack.c.bf16 %v1260_v46, %v1260_v46 }
 0x33b   : > { %v1208_v41 = vpop.f32.mrf.mxu0 }
 0x33c   : > { %3372 = vmatprep.subr.msk.bf16.mxu0 %vm1267_vm1, %v4793_v40  ;;  %v1278_v43 = vsel %vm1267_vm1, %v4793_v40, 0 }
 0x33d   : > { %3289 = vmatpush3.bf16.xpose.msra.mxu0 %v1278_v43 }
 0x33e   : > { %3373 = vmatprep.subr.msk.bf16.mxu0 %vm1267_vm1, %v4796_v42 }
 0x345   : > { %3291 = vmatpush3.bf16.xpose.msra.mxu0 %v1275_v45 }
 0x34c   : > { %3293 = vmatmul.mubr.msk.bf16.vlgmr.msra.gmra.mxu0 %vm1267_vm1, %v4806_v47 }
 0x40c   : > { %v3294_v48 = vpop.f32.mrf.mxu0 }
 0x40d   : > { %v1335_v53 = vsel %vm1328_vm2, %v3294_v48, -inf }
 0x40e   : > { %v1314_v49 = vpop.f32.mrf.mxu0 }
 0x40f   : > { %v1329_v50 = vsel %vm1328_vm2, %v1314_v49, -inf }
 0x410   : > { %1330 = vmax.xlane.f32.xlu0 %v1329_v50  ;;  %v3295_v51 = vpop.f32.mrf.mxu0 }
 0x412   : > { %v1317_v52 = vpop.f32.mrf.mxu0 }
 0x413   : > { %v1332_v54 = vsel %vm1328_vm2, %v1317_v52, -inf }
 0x414   : > { %1336 = vmax.xlane.f32.xlu0 %v1335_v53  ;;  %1333 = vmax.xlane.f32.xlu1 %v1332_v54 }
 0x499   : > { %v1331_v55 = vpop.xlane.xlu0 %1330 }
 0x49a   : > { %v1338_v56 = vsub.f32 %v1314_v49, %v1331_v55 }
 0x49c   : > { %v1341_v57 = vmul.f32 1.442695, %v1338_v56 }
 0x49d   : > { %v1337_v58 = vpop.xlane.xlu0 %1336  ;;  %v1334_v59 = vpop.xlane.xlu1 %1333 }
 0x49e   : > { %3637 = vpow2.f32 %v1341_v57  ;;  %v1340_v60 = vsub.f32 %v3294_v48, %v1337_v58  ;;  %v1339_v61 = vsub.f32 %v1317_v52, %v1334_v59 }
 0x4a0   : > { %v1345_v62 = vmul.f32 1.442695, %v1340_v60  ;;  %v1343_v63 = vmul.f32 1.442695, %v1339_v61 }
 0x4a2   : > { %3639 = vpow2.f32 %v1345_v62 }
 0x4a3   : > { %3641 = vpow2.f32 %v1343_v63 }
 0x4ab   : > { %v3638_v0 = vpop.eup %3637 }
 0x4ac   : > { %v1347_v1 = vsel %vm1328_vm2, %v3638_v0, 0.0 }
 0x4ad   : > { %1348 = vadd.xlane.f32.xlu1 %v1347_v1 }
 0x4af   : > { %v3640_v2 = vpop.eup %3639 }
 0x4b0   : > { %v3642_v3 = vpop.eup %3641  ;;  %v1353_v4 = vsel %vm1328_vm2, %v3640_v2, 0.0 }
 0x4b1   : > { %1354 = vadd.xlane.f32.xlu1 %v1353_v4  ;;  %v1350_v5 = vsel %vm1328_vm2, %v3642_v3, 0.0 }
 0x4b2   : > { %1351 = vadd.xlane.f32.xlu0 %v1350_v5 }
 0x4c2   : > { %1447 = vrot.lane.b32.xlu1 %v4796_v42, %s4201_s28 }
 0x4c6   : > { %1441 = vrot.lane.b32.xlu1 %v4786_v33, %s4201_s28 }
 0x4c8   : > { %1449 = vrot.lane.b32.xlu0 %v4793_v40, %s4201_s28 }
 0x4ca   : > { %1639 = vrot.lane.b32.xlu1 %v4793_v40, %s4202_s22 }
 0x4cc   : > { %1443 = vrot.lane.b32.xlu0 %v4806_v47, %s4201_s28 }
 0x4ce   : > { %1637 = vrot.lane.b32.xlu1 %v4796_v42, %s4202_s22 }
 0x4d0   : > { %1633 = vrot.lane.b32.xlu0 %v4786_v33, %s4202_s22 }
 0x4d2   : > { %1635 = vrot.lane.b32.xlu1 %v4806_v47, %s4202_s22 }
 0x536   : > { %v1349_v6 = vpop.xlane.xlu1 %1348 }
 0x537   : > { %3643 = vrcp.f32 %v1349_v6 }
 0x53a   : > { %v1355_v7 = vpop.xlane.xlu1 %1354 }
 0x53b   : > { %v1352_v8 = vpop.xlane.xlu0 %1351  ;;  %3645 = vrcp.f32 %v1355_v7 }
 0x53c   : > { %3647 = vrcp.f32 %v1352_v8 }
 0x53e   : > { %v1448_v13 = vpop.permute.xlu1 %1447 }
 0x53f   : > { %v1450_v9 = vpop.permute.xlu0 %1449  ;;  %v1458_v22 = vsel %vm1267_vm1, %v1448_v13, 0 }
 0x540   : > { %3375 = vmatprep.subr.msk.bf16.mxu1 %vm1267_vm1, %v1450_v9  ;;  %v1461_v20 = vsel %vm1267_vm1, %v1450_v9, 0 }
 0x542   : > { %v1442_v21 = vpop.permute.xlu1 %1441 }
 0x543   : > { %v1444_v24 = vpop.permute.xlu0 %1443 }
 0x544   : > { %v3644_v10 = vpop.eup %3643 }
 0x545   : > { %v1359_v15 = vmul.f32 %v3644_v10, %v3638_v0 }
 0x546   : > { %v1640_v23 = vpop.permute.xlu1 %1639 }
 0x547   : > { %v1634_v25 = vpop.permute.xlu0 %1633  ;;  %v1651_v26 = vsel %vm1267_vm1, %v1640_v23, 0 }
 0x548   : > { %v3646_v11 = vpop.eup %3645 }
 0x549   : > { %v3648_v12 = vpop.eup %3647  ;;  %v1361_v14 = vmul.f32 %v3646_v11, %v3640_v2 }
 0x54a   : > { %v1360_v16 = vmul.f32 %v3648_v12, %v3642_v3  ;;  %v1638_v27 = vpop.permute.xlu1 %1637 }
 0x54b   : > { %v1363_v17 = vpack.c.bf16 %v1361_v14, %v1361_v14  ;;  %v1648_v28 = vsel %vm1267_vm1, %v1638_v27, 0 }
 0x54c   : > { %v1362_v18 = vpack.c.bf16 %v1360_v16, %v1359_v15 }
 0x54e   : > { %3300 = vmatprep.mubr.msk.bf16.mxu1 %vm1328_vm2, %v1362_v18  ;;  %v1636_v29 = vpop.permute.xlu1 %1635 }
 0x54f   : > { %3301 = vmatmul.mubr.msk.bf16.vlgmr.msra.gmra.mxu1 %vm1328_vm2, %v1363_v17 }
 0x550   : > { %3305 = vmatpush3.bf16.xpose.msra.mxu1 %v1461_v20  ;;  %3308 = vmatprep.mubr.msk.bf16.mxu1 %vm1267_vm1, %v1442_v21 }
 0x551   : > { %3376 = vmatprep.subr.msk.bf16.mxu1 %vm1267_vm1, %v1448_v13 }
 0x558   : > { %3307 = vmatpush3.bf16.xpose.msra.mxu1 %v1458_v22 }
 0x559   : > { %3378 = vmatprep.subr.msk.bf16.mxu1 %vm1267_vm1, %v1640_v23 }
 0x55f   : > { %3309 = vmatmul.mubr.msk.bf16.vlgmr.msra.gmra.mxu1 %vm1267_vm1, %v1444_v24 }
 0x560   : > { %3321 = vmatpush3.bf16.xpose.msra.mxu1 %v1651_v26  ;;  %3324 = vmatprep.mubr.msk.bf16.mxu1 %vm1267_vm1, %v1634_v25 }
 0x561   : > { %3379 = vmatprep.subr.msk.bf16.mxu1 %vm1267_vm1, %v1638_v27 }
 0x568   : > { %3323 = vmatpush3.bf16.xpose.msra.mxu1 %v1648_v28 }
 0x56f   : > { %3325 = vmatmul.mubr.msk.bf16.vlgmr.msra.gmra.mxu1 %vm1267_vm1, %v1636_v29 }
 0x60f   : > { %v3302_v30 = vpop.f32.mrf.mxu1 }
 0x610   : > { %v3166_v31 = vpack.c.bf16 %v3302_v30, %v3302_v30 }
 0x611   : > { %v1408_v32 = vpop.f32.mrf.mxu1 }
 0x612   : > { %1438 = vst.msk [vmem:[#allocation2 + $0x8] sm:$0xf] %vm1435_vm3, %v3166_v31  ;;  %v3164_v35 = vpack.c.bf16 %v1408_v32, %v1408_v32 }
 0x613   : > { %v3303_v36 = vpop.f32.mrf.mxu1 }
 0x614   : > { %1436 = vst.msk [vmem:[#allocation2] sm:$0xf] %vm1435_vm3, %v3164_v35 }
 0x615   : > { %v1411_v37 = vpop.f32.mrf.mxu1 }
 0x616   : > { %v3165_v38 = vpack.c.bf16 %v1411_v37, %v1411_v37 }
 0x618   : > { %1437 = vst.msk [vmem:[#allocation2 + $0x4] sm:$0xf] %vm1435_vm3, %v3165_v38 }
 0x61f   : > { %v4846_v39 = vpop.f32.mrf.mxu1 }
 0x620   : > { %v1517_v5 = vsel %vm1328_vm2, %v4846_v39, -inf }
 0x621   : > { %v4848_v41 = vpop.f32.mrf.mxu1 }
 0x622   : > { %v1511_v4 = vsel %vm1328_vm2, %v4848_v41, -inf }
 0x623   : > { %v3311_v43 = vpop.f32.mrf.mxu1 }
 0x625   : > { %v4850_v44 = vpop.f32.mrf.mxu1 }
 0x62f   : > { %v3326_v45 = vpop.f32.mrf.mxu1 }
 0x630   : > { %v1707_v51 = vsel %vm1328_vm2, %v3326_v45, -inf }
 0x631   : > { %v1687_v46 = vpop.f32.mrf.mxu1 }
 0x632   : > { %v1701_v48 = vsel %vm1328_vm2, %v1687_v46, -inf }
 0x633   : > { %1702 = vmax.xlane.f32.xlu0 %v1701_v48  ;;  %v3327_v49 = vpop.f32.mrf.mxu1 }
 0x635   : > { %v1690_v50 = vpop.f32.mrf.mxu1 }
 0x636   : > { %v1704_v52 = vsel %vm1328_vm2, %v1690_v50, -inf }
 0x637   : > { %1708 = vmax.xlane.f32.xlu0 %v1707_v51  ;;  %1705 = vmax.xlane.f32.xlu1 %v1704_v52 }
 0x6bc   : > { %v1703_v53 = vpop.xlane.xlu0 %1702 }
 0x6bd   : > { %v1710_v54 = vsub.f32 %v1687_v46, %v1703_v53 }
 0x6bf   : > { %v1713_v55 = vmul.f32 1.442695, %v1710_v54 }
 0x6c0   : > { %v1709_v56 = vpop.xlane.xlu0 %1708  ;;  %v1706_v57 = vpop.xlane.xlu1 %1705 }
 0x6c1   : > { %3649 = vpow2.f32 %v1713_v55  ;;  %v1712_v58 = vsub.f32 %v3326_v45, %v1709_v56  ;;  %v1711_v59 = vsub.f32 %v1690_v50, %v1706_v57 }
 0x6c3   : > { %v1717_v60 = vmul.f32 1.442695, %v1712_v58  ;;  %v1715_v61 = vmul.f32 1.442695, %v1711_v59 }
 0x6c5   : > { %3651 = vpow2.f32 %v1717_v60 }
 0x6c6   : > { %3653 = vpow2.f32 %v1715_v61 }
 0x6ce   : > { %v3650_v62 = vpop.eup %3649 }
 0x6cf   : > { %v1719_v63 = vsel %vm1328_vm2, %v3650_v62, 0.0 }
 0x6d0   : > { %1720 = vadd.xlane.f32.xlu0 %v1719_v63 }
 0x6d2   : > { %v3652_v0 = vpop.eup %3651 }
 0x6d3   : > { %v3654_v1 = vpop.eup %3653  ;;  %v1725_v2 = vsel %vm1328_vm2, %v3652_v0, 0.0 }
 0x6d4   : > { %1726 = vadd.xlane.f32.xlu1 %v1725_v2  ;;  %v1722_v3 = vsel %vm1328_vm2, %v3654_v1, 0.0 }
 0x6d5   : > { %1723 = vadd.xlane.f32.xlu0 %v1722_v3 }
 0x6e5   : > { %1736 = vrot.lane.b32.xlu1 %v4788_v34, %s4202_s22 }
 0x6e9   : > { %1827 = vrot.lane.b32.xlu1 %v4793_v40, %s4203_s3  ;;  %v1514_v40 = vsel %vm1328_vm2, %v4850_v44, -inf }
 0x6eb   : > { %1738 = vrot.lane.b32.xlu0 %v4780_v19, %s4202_s22 }
 0x6ed   : > { %1825 = vrot.lane.b32.xlu1 %v4796_v42, %s4203_s3 }
 0x6ef   : > { %1821 = vrot.lane.b32.xlu0 %v4786_v33, %s4203_s3 }
 0x6f1   : > { %1823 = vrot.lane.b32.xlu1 %v4806_v47, %s4203_s3 }
 0x70e   : > { %1512 = vmax.xlane.f32.xlu0 %v1511_v4 }
 0x712   : > { %1518 = vmax.xlane.f32.xlu0 %v1517_v5 }
 0x715   : > { %1515 = vmax.xlane.f32.xlu1 %v1514_v40 }
 0x759   : > { %v1721_v6 = vpop.xlane.xlu0 %1720 }
 0x75a   : > { %3655 = vrcp.f32 %v1721_v6 }
 0x75d   : > { %v1727_v42 = vpop.xlane.xlu1 %1726 }
 0x75e   : > { %v1724_v7 = vpop.xlane.xlu0 %1723  ;;  %3657 = vrcp.f32 %v1727_v42 }
 0x75f   : > { %3659 = vrcp.f32 %v1724_v7 }
 0x761   : > { %v1737_v47 = vpop.permute.xlu1 %1736 }
 0x762   : > { %v1739_v33 = vpop.permute.xlu0 %1738 }
 0x763   : > { %v1748_v8 = vsel %vm1370_vm0, %v1739_v33, 0  ;;  %3380 = vmatprep.subr.msk.bf16.mxu1 %vm1370_vm0, %v1739_v33 }
 0x764   : > { %3329 = vmatpush3.bf16.msra.mxu1 %v1748_v8 }
 0x765   : > { %3330 = vmatprep.subr.bf16.mxu1 %v1737_v47  ;;  %v1828_v9 = vpop.permute.xlu1 %1827 }
 0x766   : > { %v1822_v18 = vpop.permute.xlu0 %1821  ;;  %v1839_v20 = vsel %vm1267_vm1, %v1828_v9, 0 }
 0x767   : > { %v3656_v10 = vpop.eup %3655 }
 0x768   : > { %3331 = vmatpush3.bf16.msra.mxu1 %v1737_v47  ;;  %v1731_v14 = vmul.f32 %v3656_v10, %v3650_v62 }
 0x769   : > { %3381 = vmatprep.subr.msk.bf16.mxu1 %vm1267_vm1, %v1828_v9  ;;  %v1826_v21 = vpop.permute.xlu1 %1825 }
 0x76a   : > { %v1836_v22 = vsel %vm1267_vm1, %v1826_v21, 0 }
 0x76b   : > { %v3658_v11 = vpop.eup %3657 }
 0x76c   : > { %v3660_v12 = vpop.eup %3659  ;;  %v1733_v13 = vmul.f32 %v3658_v11, %v3652_v0 }
 0x76d   : > { %v1732_v15 = vmul.f32 %v3660_v12, %v3654_v1  ;;  %v1824_v23 = vpop.permute.xlu1 %1823 }
 0x76e   : > { %v1735_v16 = vpack.c.bf16 %v1733_v13, %v1733_v13 }
 0x76f   : > { %v1734_v17 = vpack.c.bf16 %v1732_v15, %v1731_v14 }
 0x771   : > { %3332 = vmatprep.mubr.msk.bf16.mxu1 %vm1328_vm2, %v1734_v17 }
 0x772   : > { %3333 = vmatmul.mubr.msk.bf16.vlgmr.msra.gmra.mxu1 %vm1328_vm2, %v1735_v16 }
 0x773   : > { %3337 = vmatpush3.bf16.xpose.msra.mxu1 %v1839_v20  ;;  %3340 = vmatprep.mubr.msk.bf16.mxu1 %vm1267_vm1, %v1822_v18 }
 0x774   : > { %3382 = vmatprep.subr.msk.bf16.mxu1 %vm1267_vm1, %v1826_v21 }
 0x77b   : > { %3339 = vmatpush3.bf16.xpose.msra.mxu1 %v1836_v22 }
 0x782   : > { %3341 = vmatmul.mubr.msk.bf16.vlgmr.msra.gmra.mxu1 %vm1267_vm1, %v1824_v23 }
 0x797   : > { %v1513_v26 = vpop.xlane.xlu0 %1512 }
 0x798   : > { %v1520_v30 = vsub.f32 %v4848_v41, %v1513_v26 }
 0x79a   : > { %v1523_v35 = vmul.f32 1.442695, %v1520_v30 }
 0x79b   : > { %v1519_v31 = vpop.xlane.xlu0 %1518 }
 0x79c   : > { %v1522_v36 = vsub.f32 %v4846_v39, %v1519_v31  ;;  %v3621_v31 = vld [vmem:[%s4679_s13 + $0x38] sm:$0xff]  }
 0x79e   : > { %v1516_v24 = vpop.xlane.xlu1 %1515  ;;  %v1527_v37 = vmul.f32 1.442695, %v1522_v36  ;;  %v3624_v36 = vld [vmem:[%s4679_s13 + $0x20] sm:$0xff]  }
 0x79f   : > { %v1521_v25 = vsub.f32 %v4850_v44, %v1516_v24 }
 0x7a1   : > { %v1525_v28 = vmul.f32 1.442695, %v1521_v25 }
 0x7a3   : > { %3661 = vpow2.f32 %v1525_v28 }
 0x7a4   : > { %3663 = vpow2.f32 %v1523_v35  ;;  %v3623_v35 = vld [vmem:[%s4679_s13 + $0x28] sm:$0xff]  }
 0x7a5   : > { %3665 = vpow2.f32 %v1527_v37 }
 0x7b0   : > { %v3662_v45 = vpop.eup %3661 }
 0x7b1   : > { %v1532_v49 = vsel %vm1328_vm2, %v3662_v45, 0.0  ;;  %v3664_v51 = vpop.eup %3663 }
 0x7b2   : > { %v1529_v52 = vsel %vm1328_vm2, %v3664_v51, 0.0  ;;  %v3666_v53 = vpop.eup %3665 }
 0x7b3   : > { %v1535_v54 = vsel %vm1328_vm2, %v3666_v53, 0.0 }
 0x832   : > { %v4887_v27 = vpop.f32.mrf.mxu1 }
 0x834   : > { %v4889_v29 = vpop.f32.mrf.mxu1 }
 0x836   : > { %v3335_v32 = vpop.f32.mrf.mxu1 }
 0x837   : > { %v3622_v32 = vld [vmem:[%s4679_s13 + $0x30] sm:$0xff]  }
 0x838   : > { %v4893_v38 = vpop.f32.mrf.mxu1 }
 0x842   : > { %v3342_v43 = vpop.f32.mrf.mxu1 }
 0x843   : > { %v1895_v44 = vsel %vm1328_vm2, %v3342_v43, -inf }
 0x844   : > { %1896 = vmax.xlane.f32.xlu1 %v1895_v44  ;;  %v1875_v46 = vpop.f32.mrf.mxu1 }
 0x845   : > { %v1889_v48 = vsel %vm1328_vm2, %v1875_v46, -inf }
 0x846   : > { %1890 = vmax.xlane.f32.xlu0 %v1889_v48  ;;  %v3343_v41 = vpop.f32.mrf.mxu1  ;;  %v3626_v48 = vld [vmem:[%s4679_s13 + $0x10] sm:$0xff]  }
 0x848   : > { %v1878_v50 = vpop.f32.mrf.mxu1  ;;  %1533 = vadd.xlane.f32.xlu1 %v1532_v49 }
 0x849   : > { %v1892_v39 = vsel %vm1328_vm2, %v1878_v50, -inf }
 0x84a   : > { %1893 = vmax.xlane.f32.xlu0 %v1892_v39 }
 0x84e   : > { %1530 = vadd.xlane.f32.xlu0 %v1529_v52 }
 0x852   : > { %1536 = vadd.xlane.f32.xlu0 %v1535_v54  ;;  %v3170_v54 = vpack.c.bf16 %v4889_v29, %v4889_v29 }
 0x8cd   : > { %v1897_v55 = vpop.xlane.xlu1 %1896 }
 0x8ce   : > { %v1900_v56 = vsub.f32 %v3342_v43, %v1897_v55  ;;  %v3625_v43 = vld [vmem:[%s4679_s13 + $0x18] sm:$0xff]   ;;  %v3171_v55 = vpack.c.bf16 %v4893_v38, %v4893_v38 }
 0x8cf   : > { %v1891_v57 = vpop.xlane.xlu0 %1890 }
 0x8d0   : > { %v1905_v58 = vmul.f32 1.442695, %v1900_v56  ;;  %v1898_v59 = vsub.f32 %v1875_v46, %v1891_v57  ;;  %v3172_v57 = vpack.c.bf16 %v4887_v27, %v4887_v27 }
 0x8d1   : > { %v1534_v62 = vpop.xlane.xlu1 %1533 }
 0x8d2   : > { %3667 = vpow2.f32 %v1905_v58  ;;  %v1901_v60 = vmul.f32 1.442695, %v1898_v59 }
 0x8d3   : > { %v1894_v61 = vpop.xlane.xlu0 %1893 }
 0x8d4   : > { %3669 = vpow2.f32 %v1901_v60  ;;  %v1899_v63 = vsub.f32 %v1878_v50, %v1894_v61 }
 0x8d5   : > { %3671 = vrcp.f32 %v1534_v62 }
 0x8d6   : > { %v1903_v0 = vmul.f32 1.442695, %v1899_v63 }
 0x8d7   : > { %v1531_v1 = vpop.xlane.xlu0 %1530 }
 0x8d8   : > { %3673 = vpow2.f32 %v1903_v0 }
 0x8d9   : > { %3675 = vrcp.f32 %v1531_v1 }
 0x8db   : > { %v1537_v9 = vpop.xlane.xlu0 %1536 }
 0x8dc   : > { %3677 = vrcp.f32 %v1537_v9  ;;  %v3692_v9 = vld [vmem:[%s4725_s25] sm:$0xff] }
 0x8df   : > { %v3668_v2 = vpop.eup %3667 }
 0x8e0   : > { %v1913_v3 = vsel %vm1328_vm2, %v3668_v2, 0.0 }
 0x8e1   : > { %v3670_v4 = vpop.eup %3669  ;;  %1914 = vadd.xlane.f32.xlu1 %v1913_v3 }
 0x8e2   : > { %v3672_v5 = vpop.eup %3671  ;;  %v1907_v40 = vsel %vm1328_vm2, %v3670_v4, 0.0 }
 0x8e3   : > { %v1542_v47 = vmul.f32 %v3672_v5, %v3662_v45 }
 0x8e5   : > { %v3674_v6 = vpop.eup %3673  ;;  %1908 = vadd.xlane.f32.xlu1 %v1907_v40 }
 0x8e6   : > { %v3676_v42 = vpop.eup %3675  ;;  %v1910_v7 = vsel %vm1328_vm2, %v3674_v6, 0.0 }
 0x8e7   : > { %1911 = vadd.xlane.f32.xlu0 %v1910_v7  ;;  %v1541_v33 = vmul.f32 %v3676_v42, %v3664_v51  ;;  %v3627_v51 = vld [vmem:[%s4679_s13 + $0x8] sm:$0xff]  }
 0x8e8   : > { %v3691_v42 = vld [vmem:[%s4725_s25 + $0x10] sm:$0xff] }
 0x8e9   : > { %v1544_v8 = vpack.c.bf16 %v1542_v47, %v1541_v33  ;;  %v3678_v14 = vpop.eup %3677  ;;  %v3118_v47 = vld [vmem:[%s903_s27] ss:$0 sm:$0xff] }
 0x8eb   : > { %3316 = vmatprep.mubr.msk.bf16.mxu0 %vm1328_vm2, %v1544_v8 }
 0x8f6   : > { %1548 = vrot.lane.b32.xlu1 %v4788_v34, %s4201_s28 }
 0x8fa   : > { %1926 = vrot.lane.b32.xlu1 %v4780_v19, %s4203_s3 }
 0x8fd   : > { %1550 = vrot.lane.b32.xlu0 %v4780_v19, %s4201_s28  ;;  %v1543_v19 = vmul.f32 %v3678_v14, %v3666_v53  ;;  %v3628_v53 = vld [vmem:[%s4679_s13] sm:$0xff]  }
 0x8fe   : > { %1924 = vrot.lane.b32.xlu1 %v4788_v34, %s4203_s3 }
 0x8ff   : > { %v1545_v18 = vpack.c.bf16 %v1543_v19, %v1543_v19 }
 0x96a   : > { %v1915_v10 = vpop.xlane.xlu1 %1914 }
 0x96b   : > { %3679 = vrcp.f32 %v1915_v10 }
 0x96e   : > { %v1909_v11 = vpop.xlane.xlu1 %1908 }
 0x96f   : > { %3681 = vrcp.f32 %v1909_v11 }
 0x970   : > { %v1912_v12 = vpop.xlane.xlu0 %1911 }
 0x971   : > { %3683 = vrcp.f32 %v1912_v12 }
 0x972   : > { %v1549_v13 = vpop.permute.xlu1 %1548 }
 0x974   : > { %v1551_v15 = vpop.permute.xlu0 %1550 }
 0x975   : > { %v1560_v16 = vsel %vm1370_vm0, %v1551_v15, 0  ;;  %3377 = vmatprep.subr.msk.bf16.mxu0 %vm1370_vm0, %v1551_v15  ;;  %v3693_v15 = vld [vmem:[%s4725_s25 + $0x8] sm:$0xff] }
 0x976   : > { %3313 = vmatpush3.bf16.msra.mxu0 %v1560_v16  ;;  %v1927_v17 = vpop.permute.xlu1 %1926 }
 0x977   : > { %3314 = vmatprep.subr.bf16.mxu0 %v1549_v13  ;;  %v1936_v21 = vsel %vm1370_vm0, %v1927_v17, 0 }
 0x978   : > { %v3680_v34 = vpop.eup %3679 }
 0x979   : > { %v1921_v26 = vmul.f32 %v3680_v34, %v3668_v2 }
 0x97a   : > { %3315 = vmatpush3.bf16.msra.mxu0 %v1549_v13  ;;  %v1925_v23 = vpop.permute.xlu1 %1924 }
 0x97b   : > { %3383 = vmatprep.subr.msk.bf16.mxu0 %vm1370_vm0, %v1927_v17  ;;  %v1923_v30 = vpack.c.bf16 %v1921_v26, %v1921_v26 }
 0x97c   : > { %v3682_v20 = vpop.eup %3681 }
 0x97d   : > { %3317 = vmatmul.mubr.msk.bf16.vlgmr.msra.gmra.mxu0 %vm1328_vm2, %v1545_v18  ;;  %v1919_v24 = vmul.f32 %v3682_v20, %v3670_v4 }
 0x97e   : > { %v3684_v22 = vpop.eup %3683  ;;  %3345 = vmatpush3.bf16.msra.mxu0 %v1936_v21 }
 0x97f   : > { %3346 = vmatprep.subr.bf16.mxu0 %v1925_v23  ;;  %v1920_v25 = vmul.f32 %v3684_v22, %v3674_v6  ;;  %v3117_v6 = vld [vmem:[%s889_s1] ss:$0 sm:$0xff] }
 0x981   : > { %v1922_v28 = vpack.c.bf16 %v1920_v25, %v1919_v24 }
 0x982   : > { %3347 = vmatpush3.bf16.msra.mxu0 %v1925_v23 }
 0x983   : > { %3348 = vmatprep.mubr.msk.bf16.mxu0 %vm1328_vm2, %v1922_v28  ;;  %3352 = vmatprep.subr.bf16.mxu0 %v3621_v31 }
 0x985   : > { %3349 = vmatmul.mubr.msk.bf16.vlgmr.msra.gmra.mxu0 %vm1328_vm2, %v1923_v30 }
 0x986   : > { %3353 = vmatpush3.bf16.msra.mxu0 %v3621_v31 }
 0x987   : > { %3354 = vmatprep.subr.bf16.mxu0 %v3622_v32 }
 0x98a   : > { %3355 = vmatpush3.bf16.msra.mxu0 %v3622_v32 }
 0x98b   : > { %3356 = vmatprep.subr.bf16.mxu0 %v3623_v35 }
 0x98e   : > { %3357 = vmatpush3.bf16.msra.mxu0 %v3623_v35 }
 0x98f   : > { %3358 = vmatprep.subr.bf16.mxu0 %v3624_v36 }
 0x992   : > { %3359 = vmatpush3.bf16.msra.mxu0 %v3624_v36 }
 0x993   : > { %3360 = vmatprep.subr.bf16.mxu0 %v3625_v43 }
 0x996   : > { %3361 = vmatpush3.bf16.msra.mxu0 %v3625_v43 }
 0x997   : > { %3362 = vmatprep.subr.bf16.mxu0 %v3626_v48 }
 0x99a   : > { %3363 = vmatpush3.bf16.msra.mxu0 %v3626_v48 }
 0x99b   : > { %3364 = vmatprep.subr.bf16.mxu0 %v3627_v51 }
 0x99e   : > { %3365 = vmatpush3.bf16.msra.mxu0 %v3627_v51 }
 0x99f   : > { %3366 = vmatprep.subr.bf16.mxu0 %v3628_v53 }
 0x9a2   : > { %3367 = vmatpush3.bf16.msra.mxu0 %v3628_v53 }
 0xa3d   : > { %v3318_v37 = vpop.f32.mrf.mxu0 }
 0xa3e   : > { %v3169_v49 = vpack.c.bf16 %v3318_v37, %v3318_v37 }
 0xa3f   : > { %v1596_v44 = vpop.f32.mrf.mxu0 }
 0xa40   : > { %v3167_v45 = vpack.c.bf16 %v1596_v44, %v1596_v44 }
 0xa41   : > { %v3319_v46 = vpop.f32.mrf.mxu0 }
 0xa42   : > { %1620 = vrot.lane.b32.xlu0 %v3167_v45, %s4203_s3 }
 0xa43   : > { %v1599_v41 = vpop.f32.mrf.mxu0 }
 0xa44   : > { %v3168_v50 = vpack.c.bf16 %v1599_v41, %v1599_v41 }
 0xa45   : > { %v3350_v39 = vpop.f32.mrf.mxu0 }
 0xa46   : > { %1624 = vrot.lane.b32.xlu0 %v3169_v49, %s4203_s3  ;;  %1622 = vrot.lane.b32.xlu1 %v3168_v50, %s4203_s3  ;;  %v3175_v29 = vpack.c.bf16 %v3350_v39, %v3350_v39  ;;  %v3119_v39 = vld [vmem:[%s5287_s10] ss:$0 sm:$0xff] }
 0xa47   : > { %v1972_v52 = vpop.f32.mrf.mxu0 }
 0xa48   : > { %v3173_v58 = vpack.c.bf16 %v1972_v52, %v1972_v52 }
 0xa49   : > { %v3351_v56 = vpop.f32.mrf.mxu0 }
 0xa4a   : > { %1810 = vrot.lane.b32.xlu0 %v3171_v55, %s4202_s22  ;;  %1808 = vrot.lane.b32.xlu1 %v3170_v54, %s4202_s22  ;;  %v3120_v54 = vld [vmem:[%s5288_s5] ss:$0 sm:$0xff] }
 0xa4b   : > { %v1975_v59 = vpop.f32.mrf.mxu0 }
 0xa4c   : > { %v3174_v60 = vpack.c.bf16 %v1975_v59, %v1975_v59 }
 0xa4e   : > { %1812 = vrot.lane.b32.xlu1 %v3172_v57, %s4202_s22  ;;  %1996 = vrot.lane.b32.xlu0 %v3173_v58, %s4201_s28 }
 0xa52   : > { %2000 = vrot.lane.b32.xlu0 %v3175_v29, %s4201_s28  ;;  %1998 = vrot.lane.b32.xlu1 %v3174_v60, %s4201_s28 }
 0xab4   : > { %v1621_v38 = vpop.permute.xlu0 %1620 }
 0xab5   : > { %1630 = vst.msk [vmem:[#allocation2] sm:$0xf] %vm1629_vm4, %v1621_v38 }
 0xab8   : > { %v1625_v61 = vpop.permute.xlu0 %1624  ;;  %v1623_v62 = vpop.permute.xlu1 %1622 }
 0xab9   : > { %1632 = vst.msk [vmem:[#allocation2 + $0x8] sm:$0xf] %vm1629_vm4, %v1625_v61  ;;  %1631 = vst.msk [vmem:[#allocation2 + $0x4] sm:$0xf] %vm1629_vm4, %v1623_v62 }
 0xabc   : > { %v1811_v27 = vpop.permute.xlu0 %1810  ;;  %v1809_v63 = vpop.permute.xlu1 %1808 }
 0xabd   : > { %1819 = vst.msk [vmem:[#allocation2 + $0x4] sm:$0xf] %vm1817_vm5, %v1811_v27  ;;  %1818 = vst.msk [vmem:[#allocation2] sm:$0xf] %vm1817_vm5, %v1809_v63 }
 0xac0   : > { %v1997_v0 = vpop.permute.xlu0 %1996  ;;  %v1813_v1 = vpop.permute.xlu1 %1812 }
 0xac1   : > { %2006 = vst.msk [vmem:[#allocation2] sm:$0xf] %vm2005_vm6, %v1997_v0 }
 0xac2   : > { %1820 = vst.msk [vmem:[#allocation2 + $0x8] sm:$0xf] %vm1817_vm5, %v1813_v1 }
 0xac4   : > { %v2001_v2 = vpop.permute.xlu0 %2000  ;;  %v1999_v3 = vpop.permute.xlu1 %1998 }
 0xac5   : > { %2008 = vst.msk [vmem:[#allocation2 + $0x8] sm:$0xf] %vm2005_vm6, %v2001_v2  ;;  %2007 = vst.msk [vmem:[#allocation2 + $0x4] sm:$0xf] %vm2005_vm6, %v1999_v3 }
 0xacc   : > { %v3629_v4 = vld [vmem:[#allocation2] sm:$0xff]   ;;  %v3630_v5 = vld [vmem:[#allocation2 + $0x8] ss:$0 sps:$4 sm:$0xff]  }
 0xacd   : > { %3368 = vmatprep.mubr.bf16.mxu0 %v3629_v4 }
 0xace   : > { %3369 = vmatmul.mubr.bf16.vlgmr.msra.gmra.mxu0 %v3630_v5 }
 0xb8e   : > { %v3370_v40 = vpop.f32.mrf.mxu0 }
 0xb8f   : > { %v2136_v7 = vadd.f32 %v3691_v42, %v3370_v40 }
 0xb90   : > { %v2120_v33 = vpop.f32.mrf.mxu0 }
 0xb91   : > { %v2146_v8 = vadd.f32 %v3117_v6, %v2136_v7  ;;  %v2134_v10 = vadd.f32 %v3692_v9, %v2120_v33 }
 0xb92   : > { %v3371_v11 = vpop.f32.mrf.mxu0 }
 0xb93   : > { %v2144_v12 = vadd.f32 %v3117_v6, %v2134_v10  ;;  %v2156_v13 = vadd.f32 %v3118_v47, %v2146_v8 }
 0xb94   : > { %v2123_v14 = vpop.f32.mrf.mxu0 }
 0xb95   : > { %v2135_v16 = vadd.f32 %v3693_v15, %v2123_v14  ;;  %v2154_v19 = vadd.f32 %v3118_v47, %v2144_v12  ;;  %2228 = vst [vmem:[%s4725_s25 + $0x10] sm:$0xff] %v2156_v13 }
 0xb97   : > { %v2145_v17 = vadd.f32 %v3117_v6, %v2135_v16  ;;  %2159 = vadd.xlane.f32.xlu1 %v2154_v19  ;;  %2226 = vst [vmem:[%s4725_s25] sm:$0xff] %v2154_v19 }
 0xb99   : > { %v2155_v34 = vadd.f32 %v3118_v47, %v2145_v17 }
 0xb9b   : > { %2161 = vadd.xlane.f32.xlu0 %v2155_v34  ;;  %2227 = vst [vmem:[%s4725_s25 + $0x8] sm:$0xff] %v2155_v34 }
 0xb9f   : > { %2163 = vadd.xlane.f32.xlu0 %v2156_v13 }
 0xc20   : > { %v2160_v18 = vpop.xlane.xlu1 %2159 }
 0xc21   : > { %v2165_v20 = vmul.f32 0.0078125, %v2160_v18 }
 0xc23   : > { %v2168_v21 = vsub.f32 %v2154_v19, %v2165_v20 }
 0xc24   : > { %v2162_v22 = vpop.xlane.xlu0 %2161 }
 0xc25   : > { %v2166_v23 = vmul.f32 0.0078125, %v2162_v22  ;;  %v2171_v24 = vmul.f32 %v2168_v21, %v2168_v21 }
 0xc27   : > { %v2169_v25 = vsub.f32 %v2155_v34, %v2166_v23  ;;  %2174 = vadd.xlane.f32.xlu0 %v2171_v24 }
 0xc28   : > { %v2164_v26 = vpop.xlane.xlu0 %2163 }
 0xc29   : > { %v2167_v28 = vmul.f32 0.0078125, %v2164_v26  ;;  %v2172_v30 = vmul.f32 %v2169_v25, %v2169_v25 }
 0xc2b   : > { %v2170_v31 = vsub.f32 %v2156_v13, %v2167_v28  ;;  %2176 = vadd.xlane.f32.xlu1 %v2172_v30 }
 0xc2d   : > { %v2173_v32 = vmul.f32 %v2170_v31, %v2170_v31 }
 0xc2f   : > { %2178 = vadd.xlane.f32.xlu0 %v2173_v32 }
 0xcb0   : > { %v2175_v35 = vpop.xlane.xlu0 %2174 }
 0xcb1   : > { %v2180_v36 = vmul.f32 0.0078125, %v2175_v35 }
 0xcb3   : > { %v2183_v37 = vadd.f32 1e-06, %v2180_v36 }
 0xcb4   : > { %v2177_v43 = vpop.xlane.xlu1 %2176 }
 0xcb5   : > { %3685 = vrsqrt.f32 %v2183_v37  ;;  %v2181_v44 = vmul.f32 0.0078125, %v2177_v43 }
 0xcb7   : > { %v2184_v45 = vadd.f32 1e-06, %v2181_v44 }
 0xcb8   : > { %v2179_v46 = vpop.xlane.xlu0 %2178 }
 0xcb9   : > { %3687 = vrsqrt.f32 %v2184_v45  ;;  %v2182_v48 = vmul.f32 0.0078125, %v2179_v46 }
 0xcbb   : > { %v2185_v41 = vadd.f32 1e-06, %v2182_v48 }
 0xcbd   : > { %3689 = vrsqrt.f32 %v2185_v41 }
 0xcc2   : > { %v3686_v49 = vpop.eup %3685 }
 0xcc3   : > { %v2189_v50 = vmul.f32 %v3686_v49, %v2168_v21 }
 0xcc5   : > { %v2198_v52 = vmul.f32 %v3119_v39, %v2189_v50 }
 0xcc6   : > { %v3688_v51 = vpop.eup %3687 }
 0xcc7   : > { %v2190_v53 = vmul.f32 %v3688_v51, %v2169_v25  ;;  %v2207_v57 = vadd.f32 %v3120_v54, %v2198_v52 }
 0xcc9   : > { %v2199_v55 = vmul.f32 %v3119_v39, %v2190_v53 }
 0xcca   : > { %v3690_v56 = vpop.eup %3689 }
 0xccb   : > { %v2208_v58 = vadd.f32 %v3120_v54, %v2199_v55  ;;  %v2191_v59 = vmul.f32 %v3690_v56, %v2170_v31 }
 0xccd   : > { %v3186_v29 = vpack.c.bf16 %v2208_v58, %v2207_v57  ;;  %v2200_v60 = vmul.f32 %v3119_v39, %v2191_v59 }
 0xccf   : > { %3187 = vst [vmem:[#allocation3] sm:$0xff] %v3186_v29   ;;  %v2209_v38 = vadd.f32 %v3120_v54, %v2200_v60 }
 0xcd1   : > { %v3178_v61 = vpack.c.bf16 %v2209_v38, %v2209_v38 }
 0xcd3   : > { %2225 = vst [vmem:[#allocation3 + $0x8] sm:$0xf] %v3178_v61 }
 0xcd4 PF: > { %v3694_v62 = vld [vmem:[%s4688_s4 + $0x74] ss:$8 sps:$4 sm:$0xff]   ;;  %v3696_v27 = vld [vmem:[%s4688_s4 + $0x70] ss:$8 sps:$4 sm:$0xff]   ;;  %v4204_v63 = vmov 0   ;;  %v3724_v16 = vld [vmem:[%s4723_s14 + $0x68] sm:$0xff]   ;;  %v2250_v28 = vlaneseq }
 0xcd5   : > { %2382 = vmatprep.mubr.bf16.mxu0 %v4204_v63  ;;  %2350 = vmatprep.subr.bf16.mxu0 %v3694_v62  ;;  %v3697_v0 = vld [vmem:[%s4688_s4 + $0x64] ss:$8 sps:$4 sm:$0xff]   ;;  %v3699_v1 = vld [vmem:[%s4688_s4 + $0x60] ss:$8 sps:$4 sm:$0xff]   ;;  %v3700_v2 = vld [vmem:[%s4688_s4 + $0x54] ss:$8 sps:$4 sm:$0xff]  }
 0xcd6   : > { %2351 = vmatpush1.bf16.msra.mxu0 %v3696_v27  ;;  %v3702_v3 = vld [vmem:[%s4688_s4 + $0x50] ss:$8 sps:$4 sm:$0xff]   ;;  %v3703_v4 = vld [vmem:[%s4688_s4 + $0x44] ss:$8 sps:$4 sm:$0xff]   ;;  %v3705_v5 = vld [vmem:[%s4688_s4 + $0x40] ss:$8 sps:$4 sm:$0xff]  }
 0xcd7   : > { %2352 = vmatprep.subr.bf16.mxu0 %v3697_v0  ;;  %v3706_v40 = vld [vmem:[%s4688_s4 + $0x34] ss:$8 sps:$4 sm:$0xff]   ;;  %v3708_v6 = vld [vmem:[%s4688_s4 + $0x30] ss:$8 sps:$4 sm:$0xff]   ;;  %v3709_v42 = vld [vmem:[%s4688_s4 + $0x24] ss:$8 sps:$4 sm:$0xff]  }
 0xcd8   : > { %v3711_v7 = vld [vmem:[%s4688_s4 + $0x20] ss:$8 sps:$4 sm:$0xff]   ;;  %v3712_v33 = vld [vmem:[%s4688_s4 + $0x14] ss:$8 sps:$4 sm:$0xff]   ;;  %v3714_v47 = vld [vmem:[%s4688_s4 + $0x10] ss:$8 sps:$4 sm:$0xff]  }
 0xcd9   : > { %v3715_v8 = vld [vmem:[%s4688_s4 + $0x4] ss:$8 sps:$4 sm:$0xff]   ;;  %v3717_v9 = vld [vmem:[%s4688_s4] ss:$8 sps:$4 sm:$0xff]   ;;  %v3718_v10 = vld [vmem:[#allocation3] sm:$0xff]   ;;  %v2251_v30 = vshrl.u32 %v2250_v28, 7 }
 0xcda   : > { %2353 = vmatpush1.bf16.msra.mxu0 %v3699_v1  ;;  %v3719_v11 = vld [vmem:[#allocation3 + $0x8] ss:$0 sps:$4 sm:$0xff]   ;;  %v3722_v14 = vld [vmem:[%s4723_s14 + $0x70] sm:$0xff]   ;;  %v3725_v19 = vld [vmem:[%s4723_s14 + $0x28] sm:$0xff]   ;;  %s5291_s16 = sld [smem:[#allocation34_spill]] }
 0xcdb   : > { %2354 = vmatprep.subr.bf16.mxu0 %v3700_v2  ;;  %v3720_v12 = vld [vmem:[%s4723_s14 + $0x78] sm:$0xff]   ;;  %v3723_v15 = vld [vmem:[%s4723_s14 + $0x30] sm:$0xff]   ;;  %v3726_v17 = vld [vmem:[%s4723_s14 + $0x60] sm:$0xff]   ;;  %v2252_v31 = vsub.s32 0, %v2251_v30  ;;  %v2256_v35 = vsub.s32 1, %v2251_v30 }
 0xcdc   : > { %v3721_v13 = vld [vmem:[%s4723_s14 + $0x38] sm:$0xff]   ;;  %3240 = vmatprep.subr.bf16.mxu1 %v3720_v12  ;;  %v3727_v34 = vld [vmem:[%s4723_s14 + $0x20] sm:$0xff]   ;;  %v3730_v21 = vld [vmem:[%s4723_s14 + $0x50] sm:$0xff]  }
 0xcdd   : > { %3241 = vmatpush3.bf16.msra.mxu1 %v3721_v13  ;;  %v3728_v18 = vld [vmem:[%s4723_s14 + $0x58] sm:$0xff]   ;;  %v3731_v22 = vld [vmem:[%s4723_s14 + $0x10] sm:$0xff]   ;;  %v3732_v23 = vld [vmem:[%s4723_s14 + $0x48] sm:$0xff]  }
 0xcde   : > { %2355 = vmatpush1.bf16.msra.mxu0 %v3702_v3  ;;  %3242 = vmatprep.subr.bf16.mxu1 %v3722_v14  ;;  %v3729_v20 = vld [vmem:[%s4723_s14 + $0x18] sm:$0xff]   ;;  %v3733_v24 = vld [vmem:[%s4723_s14 + $0x8] sm:$0xff]   ;;  %v3734_v25 = vld [vmem:[%s4723_s14 + $0x40] sm:$0xff]  }
 0xcdf   : > { %2356 = vmatprep.subr.bf16.mxu0 %v3703_v4  ;;  %v3735_v26 = vld [vmem:[%s4723_s14] sm:$0xff]   ;;  %v2248_v32 = vld [vmem:[%s898_s9] sm:$0x3]  ;;  %s5290_s9 = sld [smem:[#allocation35_spill]] }
 0xce0   : > { %v2253_v36 = vrot.slane %v2248_v32, %v2252_v31  ;;  %v2257_v37 = vrot.slane %v2248_v32, %v2256_v35  ;;  %p2645_p5 = scmp.eq.s32.totalorder %s5291_s16, 1 }
 0xce1   : > { %3243 = vmatpush3.bf16.msra.mxu1 %v3723_v15 }
 0xce2   : > { %2357 = vmatpush1.bf16.msra.mxu0 %v3705_v5  ;;  %3244 = vmatprep.subr.bf16.mxu1 %v3724_v16 }
 0xce3   : > { %2358 = vmatprep.subr.bf16.mxu0 %v3706_v40 }
 0xce5   : > { %3245 = vmatpush3.bf16.msra.mxu1 %v3725_v19  ;;  %p2644_p4 = scmp.eq.s32.totalorder %s5290_s9, 1 }
 0xce6   : > { %2359 = vmatpush1.bf16.msra.mxu0 %v3708_v6  ;;  %3246 = vmatprep.subr.bf16.mxu1 %v3726_v17 }
 0xce7   : > { %2360 = vmatprep.subr.bf16.mxu0 %v3709_v42  ;;  %p5009_p7 = pnand %p2645_p5, %p2644_p4 }
 0xce8   : > { %s5293_s1 = sld [smem:[#allocation65_spill]] (!%p5009_p7) }
 0xce9   : > { %3247 = vmatpush3.bf16.msra.mxu1 %v3727_v34  ;;  %s5294_s7 = sld [smem:[#allocation66_spill]] (!%p5009_p7) }
 0xcea   : > { %2361 = vmatpush1.bf16.msra.mxu0 %v3711_v7  ;;  %3248 = vmatprep.subr.bf16.mxu1 %v3728_v18 }
 0xceb   : > { %2362 = vmatprep.subr.bf16.mxu0 %v3712_v33 }
 0xced   : > { %3249 = vmatpush3.bf16.msra.mxu1 %v3729_v20 }
 0xcee   : > { %2363 = vmatpush1.bf16.msra.mxu0 %v3714_v47  ;;  %3250 = vmatprep.subr.bf16.mxu1 %v3730_v21 }
 0xcef   : > { %2364 = vmatprep.subr.bf16.mxu0 %v3715_v8 }
 0xcf1   : > { %3251 = vmatpush3.bf16.msra.mxu1 %v3731_v22 }
 0xcf2   : > { %2365 = vmatpush1.bf16.msra.mxu0 %v3717_v9  ;;  %3252 = vmatprep.subr.bf16.mxu1 %v3732_v23 }
 0xcf5   : > { %2383 = vmatmul.mubr.bf16.vlgmr.msra.gmra.mxu0 %v3718_v10  ;;  %3253 = vmatpush3.bf16.msra.mxu1 %v3733_v24 }
 0xcf6   : > { %2392 = vmatprep.mubr.bf16.mxu0 %v4204_v63  ;;  %3254 = vmatprep.subr.bf16.mxu1 %v3734_v25 }
 0xcf9   : > { %3255 = vmatpush3.bf16.msra.mxu1 %v3735_v26 }
 0xcfd   : > { %2393 = vmatmul.mubr.bf16.gmra.mxu0 %v3719_v11 }
 0xdb5   : > { %v2384_v43 = vpop.f32.mrf.mxu0 }
 0xdb6   : > { %v5000_v44 = vadd.f32 %v2384_v43, %v2253_v36 }
 0xdb7   : > { %v2386_v45 = vpop.f32.mrf.mxu0 }
 0xdb8   : > { %v2401_v46 = vmul.f32 %v5000_v44, %v5000_v44  ;;  %v2387_v48 = vadd.f32 %v2386_v45, %v2257_v37 }
 0xdb9   : > { %v2388_v41 = vpop.f32.mrf.mxu0 }
 0xdba   : > { %v2407_v49 = vmul.f32 %v2401_v46, %v5000_v44  ;;  %v2402_v50 = vmul.f32 %v2387_v48, %v2387_v48  ;;  %v2389_v39 = vadd.f32 %v2388_v41, %v2253_v36 }
 0xdbb   : > { %v2390_v51 = vpop.f32.mrf.mxu0 }
 0xdbc   : > { %v2413_v52 = vmul.f32 0.044715, %v2407_v49  ;;  %v2408_v53 = vmul.f32 %v2402_v50, %v2387_v48  ;;  %v2403_v54 = vmul.f32 %v2389_v39, %v2389_v39  ;;  %v2391_v55 = vadd.f32 %v2390_v51, %v2257_v37 }
 0xdbd   : > { %v2394_v56 = vpop.f32.mrf.mxu0 }
 0xdbe   : > { %v2419_v57 = vadd.f32 %v2413_v52, %v5000_v44  ;;  %v2414_v58 = vmul.f32 0.044715, %v2408_v53  ;;  %v2409_v59 = vmul.f32 %v2403_v54, %v2389_v39  ;;  %v2404_v29 = vmul.f32 %v2391_v55, %v2391_v55  ;;  %v2635_v52 = vld [vmem:[%s4725_s25] sm:$0xff] }
 0xdbf   : > { %v2395_v60 = vadd.f32 %v2394_v56, %v2253_v36  ;;  %v2396_v38 = vpop.f32.mrf.mxu0 }
 0xdc0   : > { %v2425_v61 = vmul.f32 0.7978846, %v2419_v57  ;;  %v2420_v62 = vadd.f32 %v2414_v58, %v2387_v48  ;;  %v2415_v27 = vmul.f32 0.044715, %v2409_v59  ;;  %v2410_v63 = vmul.f32 %v2404_v29, %v2391_v55  ;;  %v2636_v57 = vld [vmem:[%s4725_s25 + $0x8] sm:$0xff] }
 0xdc1   : > { %v2405_v0 = vmul.f32 %v2395_v60, %v2395_v60  ;;  %v2397_v1 = vadd.f32 %v2396_v38, %v2257_v37  ;;  %v2398_v2 = vpop.f32.mrf.mxu0  ;;  %v2637_v38 = vld [vmem:[%s4725_s25 + $0x10] sm:$0xff] }
 0xdc2   : > { %v2421_v3 = vadd.f32 %v2415_v27, %v2389_v39  ;;  %v2416_v4 = vmul.f32 0.044715, %v2410_v63  ;;  %v2426_v5 = vmul.f32 0.7978846, %v2420_v62  ;;  %3736 = vtanh.f32 %v2425_v61 }
 0xdc3   : > { %v2411_v40 = vmul.f32 %v2405_v0, %v2395_v60  ;;  %v2406_v6 = vmul.f32 %v2397_v1, %v2397_v1  ;;  %v2399_v42 = vpop.f32.mrf.mxu0 }
 0xdc4   : > { %v2427_v7 = vmul.f32 0.7978846, %v2421_v3  ;;  %v2422_v33 = vadd.f32 %v2416_v4, %v2391_v55  ;;  %3738 = vtanh.f32 %v2426_v5 }
 0xdc5   : > { %v2417_v47 = vmul.f32 0.044715, %v2411_v40  ;;  %v2412_v8 = vmul.f32 %v2406_v6, %v2397_v1 }
 0xdc6   : > { %3740 = vtanh.f32 %v2427_v7  ;;  %v2428_v9 = vmul.f32 0.7978846, %v2422_v33 }
 0xdc7   : > { %v2423_v10 = vadd.f32 %v2417_v47, %v2395_v60  ;;  %v2418_v11 = vmul.f32 0.044715, %v2412_v8 }
 0xdc8   : > { %3742 = vtanh.f32 %v2428_v9 }
 0xdc9   : > { %v2429_v12 = vmul.f32 0.7978846, %v2423_v10  ;;  %v2424_v13 = vadd.f32 %v2418_v11, %v2397_v1 }
 0xdcb   : > { %3744 = vtanh.f32 %v2429_v12  ;;  %v2430_v14 = vmul.f32 0.7978846, %v2424_v13 }
 0xdcd   : > { %3746 = vtanh.f32 %v2430_v14 }
 0xdcf   : > { %v3737_v15 = vpop.eup %3736 }
 0xdd0   : > { %v2437_v34 = vadd.f32 1.0, %v3737_v15 }
 0xdd1   : > { %v3739_v16 = vpop.eup %3738 }
 0xdd2   : > { %v2438_v19 = vadd.f32 1.0, %v3739_v16  ;;  %v2443_v24 = vmul.f32 0.5, %v2437_v34 }
 0xdd3   : > { %v3741_v17 = vpop.eup %3740 }
 0xdd4   : > { %v2439_v18 = vadd.f32 1.0, %v3741_v17  ;;  %v2444_v22 = vmul.f32 0.5, %v2438_v19  ;;  %v2449_v36 = vmul.f32 %v2443_v24, %v5000_v44 }
 0xdd5   : > { %v3743_v20 = vpop.eup %3742 }
 0xdd6   : > { %v2440_v21 = vadd.f32 1.0, %v3743_v20  ;;  %v2445_v23 = vmul.f32 0.5, %v2439_v18  ;;  %v2450_v32 = vmul.f32 %v2444_v22, %v2387_v48 }
 0xdd8   : > { %v3745_v25 = vpop.eup %3744  ;;  %v2446_v26 = vmul.f32 0.5, %v2440_v21  ;;  %v2451_v28 = vmul.f32 %v2445_v23, %v2389_v39 }
 0xdd9   : > { %v2441_v30 = vadd.f32 1.0, %v3745_v25 }
 0xdda   : > { %v3747_v31 = vpop.eup %3746  ;;  %v2452_v35 = vmul.f32 %v2446_v26, %v2391_v55  ;;  %v2455_v45 = vpack.c.bf16 %v2451_v28, %v2449_v36 }
 0xddb   : > { %v2442_v37 = vadd.f32 1.0, %v3747_v31  ;;  %v2447_v41 = vmul.f32 0.5, %v2441_v30 }
 0xddc   : > { %v2456_v43 = vpack.c.bf16 %v2452_v35, %v2450_v32 }
 0xddd   : > { %v2448_v46 = vmul.f32 0.5, %v2442_v37  ;;  %v2453_v39 = vmul.f32 %v2447_v41, %v2395_v60 }
 0xdde   : > { %2619 = vmatprep.mubr.bf16.mxu1 %v2456_v43 }
 0xddf   : > { %2620 = vmatmul.mubr.bf16.vlgmr.msra.gmra.mxu1 %v2455_v45  ;;  %v2454_v49 = vmul.f32 %v2448_v46, %v2397_v1  ;;  %v2457_v48 = vpack.c.bf16 %v2453_v39, %v2453_v39 }
 0xde1   : > { %v2458_v50 = vpack.c.bf16 %v2454_v49, %v2454_v49 }
 0xde3   : > { %2627 = vmatprep.mubr.bf16.mxu1 %v2458_v50 }
 0xde7   : > { %2628 = vmatmul.mubr.bf16.gmra.mxu1 %v2457_v48 }
 0xe9f   : > { %v3256_v44 = vpop.f32.mrf.mxu1 }
 0xea1   : > { %v3257_v51 = vpop.f32.mrf.mxu1 }
 0xea2   : > { %v3258_v53 = vadd.f32 %v3257_v51, %v3256_v44 }
 0xea3   : > { %v3259_v54 = vpop.f32.mrf.mxu1 }
 0xea4   : > { %v2638_v55 = vadd.f32 %v3258_v53, %v2635_v52 }
 0xea5   : > { %v3260_v56 = vpop.f32.mrf.mxu1 }
 0xea6   : > { %2641 = vst [vmem:[%s4725_s25] sm:$0xff] %v2638_v55  ;;  %v3261_v58 = vadd.f32 %v3260_v56, %v3259_v54 }
 0xea7   : > { %v3262_v59 = vpop.f32.mrf.mxu1 }
 0xea8   : > { %v2639_v29 = vadd.f32 %v3261_v58, %v2636_v57 }
 0xea9   : > { %v3263_v60 = vpop.f32.mrf.mxu1 }
 0xeaa   : > { %2642 = vst [vmem:[%s4725_s25 + $0x8] sm:$0xff] %v2639_v29  ;;  %v3264_v61 = vadd.f32 %v3263_v60, %v3262_v59  ;;  %2649 = sbr.rel (%p5009_p7) target bundleno = 4074 (0xfea), region = 128 }
 0xeab   : > { %v3265_v62 = vpop.f32.mrf.mxu1 }
 0xeac   : > { %v2640_v27 = vadd.f32 %v3264_v61, %v2637_v38 }
 0xead   : > { %v3266_v63 = vpop.f32.mrf.mxu1 }
 0xeae   : > { %2643 = vst [vmem:[%s4725_s25 + $0x10] sm:$0xff] %v2640_v27 }
 0xeaf   : > { %v2650_v0 = vld [vmem:[%s4725_s25] sm:$0xff]  ;;  %v3158_v20 = vld [vmem:[%s5293_s1] ss:$0 sm:$0xff] }
 0xeb0   : > { %2655 = vadd.xlane.f32.xlu0 %v2650_v0  ;;  %v3159_v22 = vld [vmem:[%s5294_s7] ss:$0 sm:$0xff] }
 0xeb1   : > { %v2651_v2 = vld [vmem:[%s4725_s25 + $0x8] sm:$0xff] }
 0xeb4   : > { %2657 = vadd.xlane.f32.xlu0 %v2651_v2 }
 0xeb5   : > { %v2652_v1 = vld [vmem:[%s4725_s25 + $0x10] sm:$0xff] }
 0xeb6   : > { %2659 = vadd.xlane.f32.xlu1 %v2652_v1 }
 0xf39   : > { %v2656_v3 = vpop.xlane.xlu0 %2655 }
 0xf3a   : > { %v2662_v5 = vmul.f32 0.0078125, %v2656_v3 }
 0xf3c   : > { %v2665_v6 = vsub.f32 %v2650_v0, %v2662_v5 }
 0xf3d   : > { %v2658_v7 = vpop.xlane.xlu0 %2657 }
 0xf3e   : > { %v2663_v33 = vmul.f32 0.0078125, %v2658_v7  ;;  %v2668_v47 = vmul.f32 %v2665_v6, %v2665_v6 }
 0xf3f   : > { %v2660_v4 = vpop.xlane.xlu1 %2659 }
 0xf40   : > { %v2664_v40 = vmul.f32 0.0078125, %v2660_v4  ;;  %v2666_v8 = vsub.f32 %v2651_v2, %v2663_v33  ;;  %2671 = vadd.xlane.f32.xlu1 %v2668_v47 }
 0xf42   : > { %v2667_v42 = vsub.f32 %v2652_v1, %v2664_v40  ;;  %v2669_v10 = vmul.f32 %v2666_v8, %v2666_v8 }
 0xf44   : > { %v2670_v9 = vmul.f32 %v2667_v42, %v2667_v42  ;;  %2673 = vadd.xlane.f32.xlu0 %v2669_v10 }
 0xf46   : > { %2675 = vadd.xlane.f32.xlu1 %v2670_v9 }
 0xfc9   : > { %v2672_v11 = vpop.xlane.xlu1 %2671 }
 0xfca   : > { %v2677_v12 = vmul.f32 0.0078125, %v2672_v11 }
 0xfcc   : > { %v2680_v13 = vadd.f32 1e-06, %v2677_v12 }
 0xfcd   : > { %v2674_v15 = vpop.xlane.xlu0 %2673 }
 0xfce   : > { %3748 = vrsqrt.f32 %v2680_v13  ;;  %v2678_v19 = vmul.f32 0.0078125, %v2674_v15 }
 0xfcf   : > { %v2676_v14 = vpop.xlane.xlu1 %2675 }
 0xfd0   : > { %v2679_v16 = vmul.f32 0.0078125, %v2676_v14  ;;  %v2681_v34 = vadd.f32 1e-06, %v2678_v19 }
 0xfd2   : > { %v2682_v17 = vadd.f32 1e-06, %v2679_v16 }
 0xfd4   : > { %3750 = vrsqrt.f32 %v2682_v17 }
 0xfd5   : > { %3752 = vrsqrt.f32 %v2681_v34 }
 0xfdb   : > { %v3749_v18 = vpop.eup %3748 }
 0xfdc   : > { %v2686_v21 = vmul.f32 %v3749_v18, %v2665_v6 }
 0xfde   : > { %v2695_v23 = vmul.f32 %v3158_v20, %v2686_v21 }
 0xfe0   : > { %v2704_v26 = vadd.f32 %v3159_v22, %v2695_v23 }
 0xfe1   : > { %v3751_v24 = vpop.eup %3750 }
 0xfe2   : > { %v3753_v25 = vpop.eup %3752  ;;  %v2688_v28 = vmul.f32 %v3751_v24, %v2667_v42  ;;  %2707 = vst [vmem:[%s4725_s25] sm:$0xff] %v2704_v26 }
 0xfe3   : > { %v2687_v30 = vmul.f32 %v3753_v25, %v2666_v8 }
 0xfe4   : > { %v2697_v31 = vmul.f32 %v3158_v20, %v2688_v28 }
 0xfe5   : > { %v2696_v32 = vmul.f32 %v3158_v20, %v2687_v30 }
 0xfe6   : > { %v2706_v35 = vadd.f32 %v3159_v22, %v2697_v31 }
 0xfe7   : > { %v2705_v36 = vadd.f32 %v3159_v22, %v2696_v32 }
 0xfe8   : > { %2709 = vst [vmem:[%s4725_s25 + $0x10] sm:$0xff] %v2706_v35 }
 0xfe9   : > { %2708 = vst [vmem:[%s4725_s25 + $0x8] sm:$0xff] %v2705_v36 }
 0xfea PF: > { %s5295_s23 = sld [smem:[#allocation36_spill]]  ;;  %s2724_s15 = sshll.u32 %s4725_s25, 4  ;;  %s5040_s15 = int_to_ptr.vmem [resolvable:$true] %s2724_s15 }
 0xfeb   : > { %s5297_s28 = sld [smem:[#allocation67_spill]]  ;;  %s2711_s11 = scalar_lea.sflag [#allocation6], %s4651_s30 }
 0xfec   : > { %s4006_s13 = scalar_lea.vmem %s5040_s15, 384  ;;  %s4205_s20 = smov [#allocation19]  }
 0xfed   : > { %p4007_p6 = scmp.ne.s32.totalorder %s5040_s15, %s4006_s13  ;;  %s4010_s26 = sshll.u32 %s4205_s20, 4  ;;  %s4011_s26 = int_to_ptr.vmem [resolvable:$false] %s4010_s26 }
 0xfee   : > { %s4012_s25 = scalar_lea.vmem %s4011_s26, 768  ;;  %p4013_p2 = scmp.lt.s32.totalorder %s5040_s15, %s4011_s26 }
 0xfef   : > { %p4008_p11 = pnand %p4007_p6, %p4565_p13  ;;  %p4014_p10 = scmp.lt.s32.totalorder %s4012_s25, %s4006_s13 }
 0xff0   : > { %s3392_s14 = smul.u32 384, %s5295_s23 }
 0xff1   : > { %s5298_s3 = smov %s5297_s28  ;;  %p4009_p9 = pneg %p4008_p11 }
 0xff2   : > { %s5038_s22 = scalar_lea.hbm %s5297_s28, %s3392_s14  ;;  %p4015_p8 = por %p4014_p10, %p4013_p2 }
 0xff4   : > { %p4016_p1 = pnand %p4015_p8, %p4009_p9 }
 0xff6   : > { %4019 = shalt.err (!%p4016_p1)
}
 0xff7   : > { %s4020_s2 = scalar_lea.hbm %s5038_s22, 384  ;;  %s4024_s5 = scalar_lea.hbm %s5298_s3, 768 }
 0xff8   : > { %p4021_p12 = scmp.ne.s32.totalorder %s5038_s22, %s4020_s2  ;;  %p4025_p4 = scmp.lt.s32.totalorder %s5038_s22, %s5298_s3 }
 0xff9   : > { %p4026_p5 = scmp.lt.s32.totalorder %s4024_s5, %s4020_s2 }
 0xffa   : > { %p4022_p3 = pnand %p4021_p12, %p4565_p13 }
 0xffb   : > { %p4027_p7 = por %p4026_p5, %p4025_p4 }
 0xffc   : > { %p4023_p0 = pneg %p4022_p3 }
 0xffe   : > { %p4028_p6 = pnand %p4027_p7, %p4023_p0 }
0x1000   : > { %4031 = shalt.err (!%p4028_p6)
}
0x1001   : > { %s4206_s24 = smov 128   ;;  %s4207_s9 = smov 8  }
0x1002   : > { %3411 = dma.vmem_to_hbm [thread:$0]  (%p4565_p13), %s5040_s15, 384, %s5038_s22, %s2711_s11, %s4206_s24, %s4206_s24, %s4207_s9  }
0x1003 PF: > { %s5299_s16 = sld [smem:[#allocation40_spill]] }
0x1004   : > { %s5300_s21 = sld [smem:[#allocation31_spill]] }
0x1005   : > { %s5301_s29 = sld [smem:[#allocation51_spill]] }
0x1009   : > { %p3446_p11 = scmp.ge.s32.totalorder %s5299_s16, 2 }
0x100a   : > { %s2739_s0 = sand.u32 1, %s5300_s21  }
0x100b   : > { %p5302_p9 = scmp.ne.s32.totalorder %s5301_s29, 0  ;;  %s2740_s1 = scalar_lea.sflag [#allocation6], %s2739_s0 }
0x100d   : > { %p3442_p2 = pnand %p3446_p11, %p5302_p9 }
0x100f   : > { %p3443_p10 = pneg %p3442_p2 }
0x1011   : > { %4117 = dma.done.wait (%p3443_p10), %s2740_s1, 384  }
0x1012   : > { %4119 = vsyncadd (%p3443_p10), %s2740_s1, 4294966912  ;;  %s43_s15 = sadd.s32 1, %s5299_s16   ;;  %s5304_s18 = sld [smem:[#allocation26_spill]] }
0x1013   : > { %p5070_p8 = scmp.ge.s32.totalorder %s43_s15, 10   ;;  %s5305_s19 = sld [smem:[#allocation27_spill]] }
0x1014   : > { %s5306_s20 = sld [smem:[#allocation48_spill]] }
0x1015   : > { %s5307_s21 = sld [smem:[#allocation29_spill]] }
0x1016   : > { %s5308_s22 = sld [smem:[#allocation30_spill]] }
0x1017   : > { %s5309_s23 = sld [smem:[#allocation47_spill]] }
0x1018   : > { %s5310_s24 = sld [smem:[#allocation32_spill]] }
0x1019   : > { %s5311_s25 = sld [smem:[#allocation33_spill]] }
0x101a   : > { %s5312_s26 = sld [smem:[#allocation50_spill]] }
0x101b   : > { %s5313_s27 = sld [smem:[#allocation37_spill]] }
0x101c   : > { %s5314_s28 = sld [smem:[#allocation38_spill]]  ;;  %42 = sbr.rel (!%p5070_p8) target bundleno = 36 (0x24), region = 245 }
0x101d   : > { %s5315_s29 = sld [smem:[#allocation39_spill]] }
0x101e   : > { %s5316_s30 = sld [smem:[#allocation45_spill]] }
0x101f   : > { %s5317_s16 = sld [smem:[#allocation46_spill]] }
0x1020   : > { %s5318_s17 = sld [smem:[#allocation49_spill]] }
0x1021   :  { %2745 = vsyncpa [#allocation5], 1 }
0x1022   :  { %2747 = vsyncpa [#allocation5 + $0x1], 1 }
0x1023   :  { %2748 = vsyncpa [#allocation8], 1 }
0x1024   :  { %2750 = vsyncpa [#allocation8 + $0x1], 1 }
0x1025   :  { %2751 = vsyncpa [#allocation11], 1 }
0x1026   :  { %2753 = vsyncpa [#allocation11 + $0x1], 1 }
0x1027   :  { %2754 = vsyncpa [#allocation14], 1 }
0x1028   :  { %2756 = vsyncpa [#allocation14 + $0x1], 1 }
0x1029   :  { %2757 = vsyncpa [#allocation17], 1 }
0x102a   :  { %2759 = vsyncpa [#allocation17 + $0x1], 1 }
0x102b   :  { %2760 = vsyncpa [#allocation6], 1 }
0x102c   :  { %2762 = vsyncpa [#allocation6 + $0x1], 1 }

</bundles_post_ra>
